<compile_context>
chip_gen: v5e
topology: v5e:2x2
jax: 0.10.0
libtpu: 0.0.40
codegen_flags: <defaults>
</compile_context>

<pallas_src>
import functools

import jax
import jax.numpy as jnp
from jax.experimental import pallas as pl
from jax.experimental.pallas import tpu as pltpu


def _round_up(n, m):
    return ((n + m - 1) // m) * m


def _pad2(a, rows, cols):
    return jnp.pad(a, ((0, rows - a.shape[0]), (0, cols - a.shape[1])))


# ---------------------------------------------------------------------------
# Kernel 1: batch-invariant RBF masking of the weights (single invocation).
# ---------------------------------------------------------------------------
def _rbf_vpu(U, Vt):
    """clamp(1 - ||U_i - V_j||^2, min=0) with the tiny feature dim unrolled.

    U : [m, f], Vt : [f, n] (V pre-transposed in the wrapper), f ~ 5.
    Five broadcast-subtract-square-accumulate steps on the VPU; avoids a
    wasteful [m,5]x[5,n] MXU matmul and matches the reference formulation
    exactly (explicit diff^2, no norm-expansion cancellation).
    """
    m, f = U.shape
    n = Vt.shape[1]
    sq = jnp.zeros((m, n), jnp.float32)
    for k in range(f):                          # static unroll, f is tiny
        d = U[:, k:k + 1] - Vt[k:k + 1, :]      # [m,1] - [1,n] -> [m,n]
        sq = sq + d * d
    return jnp.maximum(1.0 - sq, 0.0)


def mask_weights_kernel(we_ref, wd_ref, ue_ref, vet_ref, ud_ref, vdt_ref,
                        wep_ref, wdp_ref):
    wep_ref[...] = we_ref[...] * _rbf_vpu(ue_ref[...], vet_ref[...])
    wdp_ref[...] = wd_ref[...] * _rbf_vpu(ud_ref[...], vdt_ref[...])


# ---------------------------------------------------------------------------
# Kernel 2: batched autoencoder body (tiled over the batch dimension only).
# ---------------------------------------------------------------------------
def ae_tile_kernel(x_ref, wep_ref, wdp_ref, be_ref, bd_ref, out_ref):
    x = x_ref[...]                                               # [tb, nu_p]
    h = jnp.maximum(
        jnp.dot(x, wep_ref[...], preferred_element_type=jnp.float32)
        + be_ref[...], 0.0)                                      # [tb, h_p]
    out = jnp.dot(h, wdp_ref[...],
                  preferred_element_type=jnp.float32) + bd_ref[...]
    out_ref[...] = out.astype(out_ref.dtype)


@functools.partial(jax.jit, static_argnames=("tile_b_max",))
def local_kernel_ae_forward(x, W_e, W_d, b_e, b_d, U_e, V_e, U_d, V_d,
                            *, tile_b_max=512):
    B, num_users = x.shape
    hidden = W_e.shape[1]
    f32 = jnp.float32

    # Lane-dense padded sizes. Zero padding is exact:
    #  * padded columns of W_e / rows of W_d are zero, so the padded parts of
    #    K_e / K_d are masked away exactly,
    #  * padded columns of x contribute nothing to the first matmul,
    #  * padded batch rows / output columns are sliced off at the end.
    nu_p = _round_up(num_users, 128)
    h_p = _round_up(hidden, 128)
    tile_b = min(tile_b_max, _round_up(B, 8))
    B_p = _round_up(B, tile_b)

    x_p = _pad2(x.astype(f32), B_p, nu_p)
    W_e_p = _pad2(W_e.astype(f32), nu_p, h_p)
    W_d_p = _pad2(W_d.astype(f32), h_p, nu_p)
    b_e_p = _pad2(b_e.reshape(1, -1).astype(f32), 1, h_p)
    b_d_p = _pad2(b_d.reshape(1, -1).astype(f32), 1, nu_p)
    U_e_p = _pad2(U_e.astype(f32), nu_p, U_e.shape[1])
    V_e_t = _pad2(V_e.T.astype(f32), V_e.shape[1], h_p)
    U_d_p = _pad2(U_d.astype(f32), h_p, U_d.shape[1])
    V_d_t = _pad2(V_d.T.astype(f32), V_d.shape[1], nu_p)

    # --- Pass 1: batch-invariant weight masking (runs once). --------------
    W_e_prime, W_d_prime = pl.pallas_call(
        mask_weights_kernel,
        out_shape=(jax.ShapeDtypeStruct((nu_p, h_p), f32),
                   jax.ShapeDtypeStruct((h_p, nu_p), f32)),
    )(W_e_p, W_d_p, U_e_p, V_e_t, U_d_p, V_d_t)

    # --- Pass 2: batched AE, batch tiled; params replicated (constant
    #     index_map => no re-DMA per step). --------------------------------
    const2 = lambda shape: pl.BlockSpec(shape, lambda i: (0, 0))
    out_p = pl.pallas_call(
        ae_tile_kernel,
        out_shape=jax.ShapeDtypeStruct((B_p, nu_p), f32),
        grid_spec=pltpu.PrefetchScalarGridSpec(
            num_scalar_prefetch=0,
            grid=(B_p // tile_b,),
            in_specs=[
                pl.BlockSpec((tile_b, nu_p), lambda i: (i, 0)),   # x tile
                const2((nu_p, h_p)),                              # W_e'
                const2((h_p, nu_p)),                              # W_d'
                const2((1, h_p)),                                 # b_e
                const2((1, nu_p)),                                # b_d
            ],
            out_specs=pl.BlockSpec((tile_b, nu_p), lambda i: (i, 0)),
        ),
        compiler_params=pltpu.CompilerParams(
            dimension_semantics=("parallel",)),
    )(x_p, W_e_prime, W_d_prime, b_e_p, b_d_p)

    return out_p[:B, :num_users]


def _reference(x, W_e, W_d, b_e, b_d, U_e, V_e, U_d, V_d):
    def rbf(U, V):
        diff = U[:, None, :] - V[None, :, :]
        return jnp.maximum(1.0 - jnp.sum(diff ** 2, axis=2), 0.0)
    K_e = rbf(U_e, V_e)
    K_d = rbf(U_d, V_d)
    h = jax.nn.relu(x @ (W_e * K_e) + b_e)
    return h @ (W_d * K_d) + b_d


if __name__ == "__main__":
    num_users = 128
    hidden_dim = 32
    batch = 16

    key = jax.random.PRNGKey(0)
    k = jax.random.split(key, 7)
    x = jax.random.normal(k[0], (batch, num_users), dtype=jnp.float32)
    W_e = jax.random.normal(k[1], (num_users, hidden_dim), dtype=jnp.float32)
    W_d = jax.random.normal(k[2], (hidden_dim, num_users), dtype=jnp.float32)
    b_e = jnp.zeros((hidden_dim,), dtype=jnp.float32)
    b_d = jnp.zeros((num_users,), dtype=jnp.float32)
    U_e = jax.random.normal(k[3], (num_users, 5), dtype=jnp.float32)
    V_e = jax.random.normal(k[4], (hidden_dim, 5), dtype=jnp.float32)
    U_d = jax.random.normal(k[5], (hidden_dim, 5), dtype=jnp.float32)
    V_d = jax.random.normal(k[6], (num_users, 5), dtype=jnp.float32)

    out = local_kernel_ae_forward(x, W_e, W_d, b_e, b_d, U_e, V_e, U_d, V_d)
    out = jax.block_until_ready(out)

    ref = _reference(x, W_e, W_d, b_e, b_d, U_e, V_e, U_d, V_d)
    assert out.shape == (batch, num_users)
    assert jnp.allclose(out, ref, atol=1e-4, rtol=1e-4), "mismatch vs reference"

    print("KERNEL_OK")
</pallas_src>

<mosaic_0001>
module attributes {stable_mosaic.version = 11 : i64} {
  func.func @ae_tile_kernel(%arg0: i32, %arg1: memref<16x128xf32, #tpu.memory_space<vmem>>, %arg2: memref<128x128xf32, #tpu.memory_space<vmem>>, %arg3: memref<128x128xf32, #tpu.memory_space<vmem>>, %arg4: memref<1x128xf32, #tpu.memory_space<vmem>>, %arg5: memref<1x128xf32, #tpu.memory_space<vmem>>, %arg6: memref<16x128xf32, #tpu.memory_space<vmem>>) attributes {dimension_semantics = [#tpu.dimension_semantics<parallel>], iteration_bounds = array<i64: 1>, scalar_prefetch = 0 : i64, scratch_operands = 0 : i64, tpu.core_type = #tpu.core_type<tc>, window_params = [{transform_indices = @transform_0, window_bounds = array<i64: 16, 128>}, {pipeline_mode = #tpu.pipeline_mode<synchronous>, transform_indices = @transform_1, window_bounds = array<i64: 128, 128>}, {pipeline_mode = #tpu.pipeline_mode<synchronous>, transform_indices = @transform_2, window_bounds = array<i64: 128, 128>}, {pipeline_mode = #tpu.pipeline_mode<synchronous>, transform_indices = @transform_3, window_bounds = array<i64: 1, 128>}, {pipeline_mode = #tpu.pipeline_mode<synchronous>, transform_indices = @transform_4, window_bounds = array<i64: 1, 128>}, {transform_indices = @transform_5, window_bounds = array<i64: 16, 128>}]} {
    %c0 = arith.constant 0 : index
    %c0_0 = arith.constant 0 : index
    %0 = vector.load %arg1[%c0, %c0_0] : memref<16x128xf32, #tpu.memory_space<vmem>>, vector<16x128xf32>
    %c0_1 = arith.constant 0 : index
    %c0_2 = arith.constant 0 : index
    %1 = vector.load %arg2[%c0_1, %c0_2] : memref<128x128xf32, #tpu.memory_space<vmem>>, vector<128x128xf32>
    %cst = arith.constant dense<0.000000e+00> : vector<16x128xf32>
    %2 = tpu.matmul %0, %1, %cst {dimension_numbers = #tpu.dot_dimension_numbers<[1], [0], [0], [1], [0, 0, 1, 1], [], []>} : vector<16x128xf32>, vector<128x128xf32>, vector<16x128xf32> -> vector<16x128xf32>
    %c0_3 = arith.constant 0 : index
    %c0_4 = arith.constant 0 : index
    %3 = vector.load %arg4[%c0_3, %c0_4] : memref<1x128xf32, #tpu.memory_space<vmem>>, vector<1x128xf32>
    %4 = vector.broadcast %3 : vector<1x128xf32> to vector<16x128xf32>
    %5 = arith.addf %2, %4 : vector<16x128xf32>
    %cst_5 = arith.constant 0.000000e+00 : f32
    %6 = vector.broadcast %cst_5 : f32 to vector<16x128xf32>
    %7 = arith.maximumf %5, %6 : vector<16x128xf32>
    %c0_6 = arith.constant 0 : index
    %c0_7 = arith.constant 0 : index
    %8 = vector.load %arg3[%c0_6, %c0_7] : memref<128x128xf32, #tpu.memory_space<vmem>>, vector<128x128xf32>
    %cst_8 = arith.constant dense<0.000000e+00> : vector<16x128xf32>
    %9 = tpu.matmul %7, %8, %cst_8 {dimension_numbers = #tpu.dot_dimension_numbers<[1], [0], [0], [1], [0, 0, 1, 1], [], []>} : vector<16x128xf32>, vector<128x128xf32>, vector<16x128xf32> -> vector<16x128xf32>
    %c0_9 = arith.constant 0 : index
    %c0_10 = arith.constant 0 : index
    %10 = vector.load %arg5[%c0_9, %c0_10] : memref<1x128xf32, #tpu.memory_space<vmem>>, vector<1x128xf32>
    %11 = vector.broadcast %10 : vector<1x128xf32> to vector<16x128xf32>
    %12 = arith.addf %9, %11 : vector<16x128xf32>
    %c0_11 = arith.constant 0 : index
    %c0_12 = arith.constant 0 : index
    %13 = vector.load %arg6[%c0_11, %c0_12] : memref<16x128xf32, #tpu.memory_space<vmem>>, vector<16x128xf32>
    tpu.vector_store %arg6[%c0_11, %c0_12], %12 {strides = array<i32>} : memref<16x128xf32, #tpu.memory_space<vmem>>, vector<16x128xf32>,
    return
  }
  func.func @transform_0(%arg0: i32) -> (i32, i32) {
    %c0_i32 = arith.constant 0 : i32
    %c0_i32_0 = arith.constant 0 : i32
    return %arg0, %c0_i32 : i32, i32
  }
  func.func @transform_1(%arg0: i32) -> (i32, i32) {
    %c0_i32 = arith.constant 0 : i32
    %c0_i32_0 = arith.constant 0 : i32
    %c0_i32_1 = arith.constant 0 : i32
    return %c0_i32, %c0_i32_0 : i32, i32
  }
  func.func @transform_2(%arg0: i32) -> (i32, i32) {
    %c0_i32 = arith.constant 0 : i32
    %c0_i32_0 = arith.constant 0 : i32
    %c0_i32_1 = arith.constant 0 : i32
    return %c0_i32, %c0_i32_0 : i32, i32
  }
  func.func @transform_3(%arg0: i32) -> (i32, i32) {
    %c0_i32 = arith.constant 0 : i32
    %c0_i32_0 = arith.constant 0 : i32
    %c0_i32_1 = arith.constant 0 : i32
    return %c0_i32, %c0_i32_0 : i32, i32
  }
  func.func @transform_4(%arg0: i32) -> (i32, i32) {
    %c0_i32 = arith.constant 0 : i32
    %c0_i32_0 = arith.constant 0 : i32
    %c0_i32_1 = arith.constant 0 : i32
    return %c0_i32, %c0_i32_0 : i32, i32
  }
  func.func @transform_5(%arg0: i32) -> (i32, i32) {
    %c0_i32 = arith.constant 0 : i32
    %c0_i32_0 = arith.constant 0 : i32
    return %arg0, %c0_i32 : i32, i32
  }
}

module attributes {stable_mosaic.version = 11 : i64} {
  func.func @mask_weights_kernel(%arg0: memref<128x128xf32, #tpu.memory_space<vmem>>, %arg1: memref<128x128xf32, #tpu.memory_space<vmem>>, %arg2: memref<128x5xf32, #tpu.memory_space<vmem>>, %arg3: memref<5x128xf32, #tpu.memory_space<vmem>>, %arg4: memref<128x5xf32, #tpu.memory_space<vmem>>, %arg5: memref<5x128xf32, #tpu.memory_space<vmem>>, %arg6: memref<128x128xf32, #tpu.memory_space<vmem>>, %arg7: memref<128x128xf32, #tpu.memory_space<vmem>>) attributes {dimension_semantics = [], scalar_prefetch = 0 : i64, scratch_operands = 0 : i64, tpu.core_type = #tpu.core_type<tc>} {
    %c0 = arith.constant 0 : index
    %c0_0 = arith.constant 0 : index
    %0 = vector.load %arg0[%c0, %c0_0] : memref<128x128xf32, #tpu.memory_space<vmem>>, vector<128x128xf32>
    %c0_1 = arith.constant 0 : index
    %c0_2 = arith.constant 0 : index
    %1 = vector.load %arg2[%c0_1, %c0_2] : memref<128x5xf32, #tpu.memory_space<vmem>>, vector<128x5xf32>
    %c0_3 = arith.constant 0 : index
    %c0_4 = arith.constant 0 : index
    %2 = vector.load %arg3[%c0_3, %c0_4] : memref<5x128xf32, #tpu.memory_space<vmem>>, vector<5x128xf32>
    %cst = arith.constant 0.000000e+00 : f32
    %3 = vector.broadcast %cst : f32 to vector<128x128xf32>
    %4 = vector.extract_strided_slice %1 {offsets = [0, 0], sizes = [128, 1], strides = [1, 1]} : vector<128x5xf32> to vector<128x1xf32>
    %5 = vector.extract_strided_slice %2 {offsets = [0, 0], sizes = [1, 128], strides = [1, 1]} : vector<5x128xf32> to vector<1x128xf32>
    %6 = vector.broadcast %4 : vector<128x1xf32> to vector<128x128xf32>
    %7 = vector.broadcast %5 : vector<1x128xf32> to vector<128x128xf32>
    %8 = arith.subf %6, %7 : vector<128x128xf32>
    %9 = arith.mulf %8, %8 : vector<128x128xf32>
    %10 = arith.addf %3, %9 : vector<128x128xf32>
    %11 = vector.extract_strided_slice %1 {offsets = [0, 1], sizes = [128, 1], strides = [1, 1]} : vector<128x5xf32> to vector<128x1xf32>
    %12 = vector.extract_strided_slice %2 {offsets = [1, 0], sizes = [1, 128], strides = [1, 1]} : vector<5x128xf32> to vector<1x128xf32>
    %13 = vector.broadcast %11 : vector<128x1xf32> to vector<128x128xf32>
    %14 = vector.broadcast %12 : vector<1x128xf32> to vector<128x128xf32>
    %15 = arith.subf %13, %14 : vector<128x128xf32>
    %16 = arith.mulf %15, %15 : vector<128x128xf32>
    %17 = arith.addf %10, %16 : vector<128x128xf32>
    %18 = vector.extract_strided_slice %1 {offsets = [0, 2], sizes = [128, 1], strides = [1, 1]} : vector<128x5xf32> to vector<128x1xf32>
    %19 = vector.extract_strided_slice %2 {offsets = [2, 0], sizes = [1, 128], strides = [1, 1]} : vector<5x128xf32> to vector<1x128xf32>
    %20 = vector.broadcast %18 : vector<128x1xf32> to vector<128x128xf32>
    %21 = vector.broadcast %19 : vector<1x128xf32> to vector<128x128xf32>
    %22 = arith.subf %20, %21 : vector<128x128xf32>
    %23 = arith.mulf %22, %22 : vector<128x128xf32>
    %24 = arith.addf %17, %23 : vector<128x128xf32>
    %25 = vector.extract_strided_slice %1 {offsets = [0, 3], sizes = [128, 1], strides = [1, 1]} : vector<128x5xf32> to vector<128x1xf32>
    %26 = vector.extract_strided_slice %2 {offsets = [3, 0], sizes = [1, 128], strides = [1, 1]} : vector<5x128xf32> to vector<1x128xf32>
    %27 = vector.broadcast %25 : vector<128x1xf32> to vector<128x128xf32>
    %28 = vector.broadcast %26 : vector<1x128xf32> to vector<128x128xf32>
    %29 = arith.subf %27, %28 : vector<128x128xf32>
    %30 = arith.mulf %29, %29 : vector<128x128xf32>
    %31 = arith.addf %24, %30 : vector<128x128xf32>
    %32 = vector.extract_strided_slice %1 {offsets = [0, 4], sizes = [128, 1], strides = [1, 1]} : vector<128x5xf32> to vector<128x1xf32>
    %33 = vector.extract_strided_slice %2 {offsets = [4, 0], sizes = [1, 128], strides = [1, 1]} : vector<5x128xf32> to vector<1x128xf32>
    %34 = vector.broadcast %32 : vector<128x1xf32> to vector<128x128xf32>
    %35 = vector.broadcast %33 : vector<1x128xf32> to vector<128x128xf32>
    %36 = arith.subf %34, %35 : vector<128x128xf32>
    %37 = arith.mulf %36, %36 : vector<128x128xf32>
    %38 = arith.addf %31, %37 : vector<128x128xf32>
    %cst_5 = arith.constant 1.000000e+00 : f32
    %39 = vector.broadcast %cst_5 : f32 to vector<128x128xf32>
    %40 = arith.subf %39, %38 : vector<128x128xf32>
    %cst_6 = arith.constant 0.000000e+00 : f32
    %41 = vector.broadcast %cst_6 : f32 to vector<128x128xf32>
    %42 = arith.maximumf %40, %41 : vector<128x128xf32>
    %43 = arith.mulf %0, %42 : vector<128x128xf32>
    %c0_7 = arith.constant 0 : index
    %c0_8 = arith.constant 0 : index
    %44 = vector.load %arg6[%c0_7, %c0_8] : memref<128x128xf32, #tpu.memory_space<vmem>>, vector<128x128xf32>
    tpu.vector_store %arg6[%c0_7, %c0_8], %43 {strides = array<i32>} : memref<128x128xf32, #tpu.memory_space<vmem>>, vector<128x128xf32>,
    %c0_9 = arith.constant 0 : index
    %c0_10 = arith.constant 0 : index
    %45 = vector.load %arg1[%c0_9, %c0_10] : memref<128x128xf32, #tpu.memory_space<vmem>>, vector<128x128xf32>
    %c0_11 = arith.constant 0 : index
    %c0_12 = arith.constant 0 : index
    %46 = vector.load %arg4[%c0_11, %c0_12] : memref<128x5xf32, #tpu.memory_space<vmem>>, vector<128x5xf32>
    %c0_13 = arith.constant 0 : index
    %c0_14 = arith.constant 0 : index
    %47 = vector.load %arg5[%c0_13, %c0_14] : memref<5x128xf32, #tpu.memory_space<vmem>>, vector<5x128xf32>
    %cst_15 = arith.constant 0.000000e+00 : f32
    %48 = vector.broadcast %cst_15 : f32 to vector<128x128xf32>
    %49 = vector.extract_strided_slice %46 {offsets = [0, 0], sizes = [128, 1], strides = [1, 1]} : vector<128x5xf32> to vector<128x1xf32>
    %50 = vector.extract_strided_slice %47 {offsets = [0, 0], sizes = [1, 128], strides = [1, 1]} : vector<5x128xf32> to vector<1x128xf32>
    %51 = vector.broadcast %49 : vector<128x1xf32> to vector<128x128xf32>
    %52 = vector.broadcast %50 : vector<1x128xf32> to vector<128x128xf32>
    %53 = arith.subf %51, %52 : vector<128x128xf32>
    %54 = arith.mulf %53, %53 : vector<128x128xf32>
    %55 = arith.addf %48, %54 : vector<128x128xf32>
    %56 = vector.extract_strided_slice %46 {offsets = [0, 1], sizes = [128, 1], strides = [1, 1]} : vector<128x5xf32> to vector<128x1xf32>
    %57 = vector.extract_strided_slice %47 {offsets = [1, 0], sizes = [1, 128], strides = [1, 1]} : vector<5x128xf32> to vector<1x128xf32>
    %58 = vector.broadcast %56 : vector<128x1xf32> to vector<128x128xf32>
    %59 = vector.broadcast %57 : vector<1x128xf32> to vector<128x128xf32>
    %60 = arith.subf %58, %59 : vector<128x128xf32>
    %61 = arith.mulf %60, %60 : vector<128x128xf32>
    %62 = arith.addf %55, %61 : vector<128x128xf32>
    %63 = vector.extract_strided_slice %46 {offsets = [0, 2], sizes = [128, 1], strides = [1, 1]} : vector<128x5xf32> to vector<128x1xf32>
    %64 = vector.extract_strided_slice %47 {offsets = [2, 0], sizes = [1, 128], strides = [1, 1]} : vector<5x128xf32> to vector<1x128xf32>
    %65 = vector.broadcast %63 : vector<128x1xf32> to vector<128x128xf32>
    %66 = vector.broadcast %64 : vector<1x128xf32> to vector<128x128xf32>
    %67 = arith.subf %65, %66 : vector<128x128xf32>
    %68 = arith.mulf %67, %67 : vector<128x128xf32>
    %69 = arith.addf %62, %68 : vector<128x128xf32>
    %70 = vector.extract_strided_slice %46 {offsets = [0, 3], sizes = [128, 1], strides = [1, 1]} : vector<128x5xf32> to vector<128x1xf32>
    %71 = vector.extract_strided_slice %47 {offsets = [3, 0], sizes = [1, 128], strides = [1, 1]} : vector<5x128xf32> to vector<1x128xf32>
    %72 = vector.broadcast %70 : vector<128x1xf32> to vector<128x128xf32>
    %73 = vector.broadcast %71 : vector<1x128xf32> to vector<128x128xf32>
    %74 = arith.subf %72, %73 : vector<128x128xf32>
    %75 = arith.mulf %74, %74 : vector<128x128xf32>
    %76 = arith.addf %69, %75 : vector<128x128xf32>
    %77 = vector.extract_strided_slice %46 {offsets = [0, 4], sizes = [128, 1], strides = [1, 1]} : vector<128x5xf32> to vector<128x1xf32>
    %78 = vector.extract_strided_slice %47 {offsets = [4, 0], sizes = [1, 128], strides = [1, 1]} : vector<5x128xf32> to vector<1x128xf32>
    %79 = vector.broadcast %77 : vector<128x1xf32> to vector<128x128xf32>
    %80 = vector.broadcast %78 : vector<1x128xf32> to vector<128x128xf32>
    %81 = arith.subf %79, %80 : vector<128x128xf32>
    %82 = arith.mulf %81, %81 : vector<128x128xf32>
    %83 = arith.addf %76, %82 : vector<128x128xf32>
    %cst_16 = arith.constant 1.000000e+00 : f32
    %84 = vector.broadcast %cst_16 : f32 to vector<128x128xf32>
    %85 = arith.subf %84, %83 : vector<128x128xf32>
    %cst_17 = arith.constant 0.000000e+00 : f32
    %86 = vector.broadcast %cst_17 : f32 to vector<128x128xf32>
    %87 = arith.maximumf %85, %86 : vector<128x128xf32>
    %88 = arith.mulf %45, %87 : vector<128x128xf32>
    %c0_18 = arith.constant 0 : index
    %c0_19 = arith.constant 0 : index
    %89 = vector.load %arg7[%c0_18, %c0_19] : memref<128x128xf32, #tpu.memory_space<vmem>>, vector<128x128xf32>
    tpu.vector_store %arg7[%c0_18, %c0_19], %88 {strides = array<i32>} : memref<128x128xf32, #tpu.memory_space<vmem>>, vector<128x128xf32>,
    return
  }
}

</mosaic_0001>

<bundles_post_ra>
// kernel: local_kernel_ae_forward.3
= control target key start
LH: loop header
LB: loop body
LE: loop exit
PB: predicated region body
PF: predicated region fallthrough
CT: control target
= control target key end

     0   :  { %s338_s0 = inlined_call_operand.vmem [shape: f32[16,128], index: 0, kind: input, shape index: {}]   ;;  %s339_s1 = inlined_call_operand.vmem [shape: f32[128,128], index: 1, kind: input, shape index: {}]   ;;  %s340_s2 = inlined_call_operand.vmem [shape: f32[128,128], index: 2, kind: input, shape index: {}]   ;;  %s341_s3 = inlined_call_operand.vmem [shape: f32[1,128], index: 3, kind: input, shape index: {}]   ;;  %s342_s4 = inlined_call_operand.vmem [shape: f32[1,128], index: 4, kind: input, shape index: {}]   ;;  %s343_s5 = inlined_call_operand.hbm [shape: f32[16,128], index: 5, kind: output, shape index: {}]  }
   0x1   :  { %v38_v0 = vld [vmem:[%s339_s1 + $0x78] sm:$0xff]  ;;  %v37_v1 = vld [vmem:[%s339_s1 + $0x70] sm:$0xff]  ;;  %v36_v2 = vld [vmem:[%s339_s1 + $0x68] sm:$0xff] }
   0x2   :  { %131 = vmatpush.msra.mxu2 %v38_v0  ;;  %43 = vmatpush.msra.mxu0 %v38_v0  ;;  %v35_v3 = vld [vmem:[%s339_s1 + $0x60] sm:$0xff]  ;;  %v34_v4 = vld [vmem:[%s339_s1 + $0x58] sm:$0xff]  ;;  %v82_v6 = vld [vmem:[%s340_s2 + $0x70] sm:$0xff] }
   0x3   :  { %v83_v5 = vld [vmem:[%s340_s2 + $0x78] sm:$0xff]  ;;  %v33_v7 = vld [vmem:[%s339_s1 + $0x50] sm:$0xff]  ;;  %v81_v8 = vld [vmem:[%s340_s2 + $0x68] sm:$0xff] }
   0x4   :  { %132 = vmatpush.msra.mxu2 %v37_v1  ;;  %44 = vmatpush.msra.mxu0 %v37_v1  ;;  %v32_v9 = vld [vmem:[%s339_s1 + $0x48] sm:$0xff]  ;;  %v80_v10 = vld [vmem:[%s340_s2 + $0x60] sm:$0xff] }
   0x5   :  { %147 = vmatpush.msra.mxu3 %v83_v5  ;;  %88 = vmatpush.msra.mxu1 %v83_v5 }
   0x6   :  { %133 = vmatpush.msra.mxu2 %v36_v2  ;;  %45 = vmatpush.msra.mxu0 %v36_v2 }
   0x7   :  { %148 = vmatpush.msra.mxu3 %v82_v6  ;;  %89 = vmatpush.msra.mxu1 %v82_v6 }
   0x8   :  { %134 = vmatpush.msra.mxu2 %v35_v3  ;;  %46 = vmatpush.msra.mxu0 %v35_v3 }
   0xa   :  { %135 = vmatpush.msra.mxu2 %v34_v4  ;;  %47 = vmatpush.msra.mxu0 %v34_v4 }
   0xc   :  { %136 = vmatpush.msra.mxu2 %v33_v7  ;;  %48 = vmatpush.msra.mxu0 %v33_v7 }
   0xd   :  { %10 = vsyncpa [#allocation3], 0  ;;  %v31_v11 = vld [vmem:[%s339_s1 + $0x40] sm:$0xff]  ;;  %149 = vmatpush.msra.mxu3 %v81_v8  ;;  %90 = vmatpush.msra.mxu1 %v81_v8  ;;  %v79_v12 = vld [vmem:[%s340_s2 + $0x58] sm:$0xff]  ;;  %s195_s16 = smov 128   ;;  %s196_s17 = smov 8  }
   0xe   :  { %137 = vmatpush.msra.mxu2 %v32_v9  ;;  %49 = vmatpush.msra.mxu0 %v32_v9  ;;  %v30_v13 = vld [vmem:[%s339_s1 + $0x38] sm:$0xff]  ;;  %v78_v14 = vld [vmem:[%s340_s2 + $0x50] sm:$0xff]  ;;  %v77_v16 = vld [vmem:[%s340_s2 + $0x48] sm:$0xff] }
   0xf   :  { %150 = vmatpush.msra.mxu3 %v80_v10  ;;  %91 = vmatpush.msra.mxu1 %v80_v10  ;;  %v29_v15 = vld [vmem:[%s339_s1 + $0x30] sm:$0xff]  ;;  %v28_v17 = vld [vmem:[%s339_s1 + $0x28] sm:$0xff]  ;;  %v76_v18 = vld [vmem:[%s340_s2 + $0x40] sm:$0xff] }
  0x10   :  { %138 = vmatpush.msra.mxu2 %v31_v11  ;;  %50 = vmatpush.msra.mxu0 %v31_v11  ;;  %v27_v19 = vld [vmem:[%s339_s1 + $0x20] sm:$0xff]  ;;  %v75_v20 = vld [vmem:[%s340_s2 + $0x38] sm:$0xff]  ;;  %v74_v22 = vld [vmem:[%s340_s2 + $0x30] sm:$0xff] }
  0x11   :  { %151 = vmatpush.msra.mxu3 %v79_v12  ;;  %92 = vmatpush.msra.mxu1 %v79_v12  ;;  %v26_v21 = vld [vmem:[%s339_s1 + $0x18] sm:$0xff]  ;;  %v25_v23 = vld [vmem:[%s339_s1 + $0x10] sm:$0xff]  ;;  %v73_v24 = vld [vmem:[%s340_s2 + $0x28] sm:$0xff] }
  0x12   :  { %139 = vmatpush.msra.mxu2 %v30_v13  ;;  %51 = vmatpush.msra.mxu0 %v30_v13  ;;  %v24_v25 = vld [vmem:[%s339_s1 + $0x8] sm:$0xff]  ;;  %v72_v26 = vld [vmem:[%s340_s2 + $0x20] sm:$0xff]  ;;  %v71_v30 = vld [vmem:[%s340_s2 + $0x18] sm:$0xff] }
  0x13   :  { %152 = vmatpush.msra.mxu3 %v78_v14  ;;  %93 = vmatpush.msra.mxu1 %v78_v14  ;;  %v23_v27 = vld [vmem:[%s339_s1] sm:$0xff]  ;;  %v22_v28 = vld [vmem:[%s338_s0 + $0x8] sm:$0xff]  ;;  %v70_v31 = vld [vmem:[%s340_s2 + $0x10] sm:$0xff] }
  0x14   :  { %140 = vmatpush.msra.mxu2 %v29_v15  ;;  %52 = vmatpush.msra.mxu0 %v29_v15  ;;  %v21_v29 = vld [vmem:[%s338_s0] sm:$0xff]  ;;  %v69_v32 = vld [vmem:[%s340_s2 + $0x8] sm:$0xff] }
  0x15   :  { %153 = vmatpush.msra.mxu3 %v77_v16  ;;  %94 = vmatpush.msra.mxu1 %v77_v16  ;;  %v68_v33 = vld [vmem:[%s340_s2] sm:$0xff]  ;;  %s194_s2 = smov [#allocation2]  }
  0x16   :  { %141 = vmatpush.msra.mxu2 %v28_v17  ;;  %53 = vmatpush.msra.mxu0 %v28_v17  ;;  %v166_v34 = vld [vmem:[%s341_s3] ss:$0 sm:$0xff]  ;;  %s117_s13 = sshll.u32 %s194_s2, 4  ;;  %s119_s3 = sshll.u32 %s343_s5, 4  ;;  %s118_s13 = int_to_ptr.vmem [resolvable:$true] %s117_s13  ;;  %s120_s3 = int_to_ptr.hbm [resolvable:$true] %s119_s3 }
  0x17   :  { %154 = vmatpush.msra.mxu3 %v76_v18  ;;  %95 = vmatpush.msra.mxu1 %v76_v18  ;;  %v167_v41 = vld [vmem:[%s342_s4] ss:$0 sm:$0xff] }
  0x18   :  { %142 = vmatpush.msra.mxu2 %v27_v19  ;;  %54 = vmatpush.msra.mxu0 %v27_v19 }
  0x19   :  { %155 = vmatpush.msra.mxu3 %v75_v20  ;;  %96 = vmatpush.msra.mxu1 %v75_v20 }
  0x1a   :  { %143 = vmatpush.msra.mxu2 %v26_v21  ;;  %55 = vmatpush.msra.mxu0 %v26_v21 }
  0x1b   :  { %156 = vmatpush.msra.mxu3 %v74_v22  ;;  %97 = vmatpush.msra.mxu1 %v74_v22 }
  0x1c   :  { %144 = vmatpush.msra.mxu2 %v25_v23  ;;  %56 = vmatpush.msra.mxu0 %v25_v23 }
  0x1d   :  { %157 = vmatpush.msra.mxu3 %v73_v24  ;;  %98 = vmatpush.msra.mxu1 %v73_v24 }
  0x1e   :  { %145 = vmatpush.msra.mxu2 %v24_v25  ;;  %57 = vmatpush.msra.mxu0 %v24_v25 }
  0x1f   :  { %158 = vmatpush.msra.mxu3 %v72_v26  ;;  %99 = vmatpush.msra.mxu1 %v72_v26 }
  0x20   :  { %146 = vmatpush.msra.mxu2 %v23_v27  ;;  %58 = vmatpush.msra.mxu0 %v23_v27 }
  0x21   :  { %62 = vmatmul.f32.vlgmr.msra.gmra.mxu2 %v22_v28  ;;  %59 = vmatmul.f32.vlgmr.msra.gmra.mxu0 %v21_v29 }
  0x22   :  { %159 = vmatpush.msra.mxu3 %v71_v30  ;;  %100 = vmatpush.msra.mxu1 %v71_v30 }
  0x24   :  { %160 = vmatpush.msra.mxu3 %v70_v31  ;;  %101 = vmatpush.msra.mxu1 %v70_v31 }
  0x26   :  { %161 = vmatpush.msra.mxu3 %v69_v32  ;;  %102 = vmatpush.msra.mxu1 %v69_v32 }
  0x28   :  { %162 = vmatpush.msra.mxu3 %v68_v33  ;;  %103 = vmatpush.msra.mxu1 %v68_v33 }
  0x9e   :  { %v60_v35 = vpop.f32.mrf.mxu0 }
  0x9f   :  { %v61_v36 = vadd.f32 %v166_v34, %v60_v35 }
  0xa1   :  { %v66_v37 = vmax.f32 %v61_v36, 0.0 }
  0xa3   :  { %104 = vmatmul.f32.vlgmr.msra.gmra.mxu1 %v66_v37 }
  0xa4   :  { %v63_v38 = vpop.f32.mrf.mxu2 }
  0xa5   :  { %v64_v39 = vadd.f32 %v166_v34, %v63_v38 }
  0xa7   :  { %v67_v40 = vmax.f32 %v64_v39, 0.0 }
  0xa9   :  { %107 = vmatmul.f32.vlgmr.msra.gmra.mxu3 %v67_v40 }
 0x120   :  { %v105_v42 = vpop.f32.mrf.mxu1 }
 0x121   :  { %v106_v43 = vadd.f32 %v167_v41, %v105_v42 }
 0x123   :  { %111 = vst [vmem:[#allocation2] sm:$0xff] %v106_v43 }
 0x12c   :  { %v108_v44 = vpop.f32.mrf.mxu3 }
 0x12d   :  { %v109_v45 = vadd.f32 %v167_v41, %v108_v44 }
 0x12f   :  { %112 = vst [vmem:[#allocation2 + $0x8] sm:$0xff] %v109_v45 }
 0x130   :  { %125 = dma.vmem_to_hbm [thread:$0]  %s118_s13, 256, %s120_s3, [#allocation3], %s195_s16, %s195_s16, %s196_s17  }
 0x131   :  { %192 = dma.done.wait [#allocation3], 256  }
 0x132   :  { %193 = vsyncadd [#allocation3], 4294967040 }
 0x133   :  { %130 = vsyncpa [#allocation3], 1 }

// kernel: local_kernel_ae_forward.2
= control target key start
LH: loop header
LB: loop body
LE: loop exit
PB: predicated region body
PF: predicated region fallthrough
CT: control target
= control target key end

     0   :  { %v2577_v0 = vmov 0   ;;  %v2573_v17 = vmov 1   ;;  %v2569_v23 = vmov 2   ;;  %v2575_v36 = vmov 3   ;;  %s2561_s2 = inlined_call_operand.vmem [shape: f32[128,5], index: 2, kind: input, shape index: {}]   ;;  %s2562_s4 = inlined_call_operand.vmem [shape: f32[128,5], index: 4, kind: input, shape index: {}]   ;;  %s2563_s3 = inlined_call_operand.vmem [shape: f32[5,128], index: 3, kind: input, shape index: {}]   ;;  %s2564_s0 = inlined_call_operand.vmem [shape: f32[128,128], index: 0, kind: input, shape index: {}]   ;;  %s2565_s6 = inlined_call_operand.vmem [shape: f32[128,128], index: 6, kind: output, shape index: {0}]   ;;  %s2566_s5 = inlined_call_operand.vmem [shape: f32[5,128], index: 5, kind: input, shape index: {}]   ;;  %s2567_s1 = inlined_call_operand.vmem [shape: f32[128,128], index: 1, kind: input, shape index: {}]   ;;  %s2568_s7 = inlined_call_operand.vmem [shape: f32[128,128], index: 7, kind: output, shape index: {1}]  }
   0x1   :  { %1396 = vset.pattern.permute.xlu2 %v2577_v0  ;;  %1395 = vset.pattern.permute.xlu1 %v2577_v0  ;;  %v1482_v1 = vld [vmem:[%s2561_s2 + $0x20] sm:$0xff]  ;;  %v1487_v2 = vld [vmem:[%s2561_s2 + $0x10] sm:$0xff]  ;;  %v1501_v4 = vld [vmem:[%s2561_s2 + $0x28] sm:$0xff] }
   0x2   :  { %2583 = vst [vmem:[#allocation2_spill] sm:$0xff] %v1487_v2  ;;  %v1492_v3 = vld [vmem:[%s2561_s2] sm:$0xff]  ;;  %1394 = vset.pattern.permute.xlu0 %v2577_v0  ;;  %80 = vperm.xlu2 %1396, %v1482_v1   ;;  %v1506_v5 = vld [vmem:[%s2561_s2 + $0x18] sm:$0xff]  ;;  %v1511_v6 = vld [vmem:[%s2561_s2 + $0x8] sm:$0xff] }
   0x3   :  { %70 = vperm.xlu1 %1395, %v1487_v2   ;;  %60 = vperm.xlu0 %1394, %v1492_v3   ;;  %v1519_v7 = vld [vmem:[%s2561_s2 + $0x40] sm:$0xff]  ;;  %v1524_v8 = vld [vmem:[%s2561_s2 + $0x38] sm:$0xff]  ;;  %v1529_v9 = vld [vmem:[%s2561_s2 + $0x30] sm:$0xff] }
   0x4   :  { %2584 = vst [vmem:[#allocation3_spill] sm:$0xff] %v1524_v8  ;;  %v1537_v10 = vld [vmem:[%s2561_s2 + $0x58] sm:$0xff]  ;;  %v1542_v11 = vld [vmem:[%s2561_s2 + $0x50] sm:$0xff]  ;;  %v1547_v12 = vld [vmem:[%s2561_s2 + $0x48] sm:$0xff] }
   0x5   :  { %2585 = vst [vmem:[#allocation4_spill] sm:$0xff] %v1542_v11  ;;  %v1555_v13 = vld [vmem:[%s2561_s2 + $0x70] sm:$0xff]  ;;  %v1560_v14 = vld [vmem:[%s2561_s2 + $0x68] sm:$0xff]  ;;  %v1565_v15 = vld [vmem:[%s2561_s2 + $0x60] sm:$0xff] }
   0x6   :  { %2586 = vst [vmem:[#allocation5_spill] sm:$0xff] %v1560_v14  ;;  %v1573_v16 = vld [vmem:[%s2561_s2 + $0x78] sm:$0xff]  ;;  %v1583_v18 = vld [vmem:[%s2562_s4] sm:$0xff]  ;;  %v1591_v19 = vld [vmem:[%s2562_s4 + $0x28] sm:$0xff] }
   0x7   :  { %v1599_v20 = vld [vmem:[%s2562_s4 + $0x40] sm:$0xff]  ;;  %v1607_v21 = vld [vmem:[%s2562_s4 + $0x58] sm:$0xff]  ;;  %v1615_v22 = vld [vmem:[%s2562_s4 + $0x70] sm:$0xff] }
   0x8   :  { %v1650_v30 = vld [vmem:[%s2562_s4 + $0x8] sm:$0xff]  ;;  %v1664_v34 = vld [vmem:[%s2562_s4 + $0x30] sm:$0xff]  ;;  %v1685_v42 = vld [vmem:[%s2563_s3] sm:$0x1f] }
   0x9   :  { %v1677_v39 = vld [vmem:[%s2562_s4 + $0x48] sm:$0xff]  ;;  %v1693_v44 = vperm.slane %v1685_v42, 0  ;;  %v1698_v45 = vld [vmem:[%s2562_s4 + $0x60] sm:$0xff]  ;;  %v1702_v47 = vperm.slane %v1685_v42, 1  ;;  %v1713_v54 = vld [vmem:[%s2562_s4 + $0x78] sm:$0xff] }
   0xa   :  { %85 = vperm.xlu2 %1396, %v1501_v4  }
   0xb   :  { %75 = vperm.xlu1 %1395, %v1506_v5   ;;  %65 = vperm.xlu0 %1394, %v1511_v6  }
  0x12   :  { %100 = vperm.xlu2 %1396, %v1519_v7  }
  0x13   :  { %95 = vperm.xlu1 %1395, %v1524_v8   ;;  %90 = vperm.xlu0 %1394, %v1529_v9  }
  0x1a   :  { %115 = vperm.xlu2 %1396, %v1537_v10  }
  0x1b   :  { %110 = vperm.xlu1 %1395, %v1542_v11   ;;  %105 = vperm.xlu0 %1394, %v1547_v12  }
  0x22   :  { %130 = vperm.xlu2 %1396, %v1555_v13  }
  0x23   :  { %125 = vperm.xlu1 %1395, %v1560_v14   ;;  %120 = vperm.xlu0 %1394, %v1565_v15  }
  0x2a   :  { %1398 = vset.pattern.permute.xlu2 %v2573_v17 }
  0x2b   :  { %1397 = vset.pattern.permute.xlu1 %v2573_v17  ;;  %135 = vperm.xlu0 %1394, %v1573_v16  }
  0x2c   :  { %192 = vperm.xlu2 %1398, %v1511_v6   ;;  %188 = vperm.xlu1 %1397, %v1492_v3  }
  0x33   :  { %738 = vperm.xlu0 %1394, %v1583_v18  }
  0x34   :  { %204 = vperm.xlu2 %1398, %v1482_v1   ;;  %200 = vperm.xlu1 %1397, %v1506_v5  }
  0x3b   :  { %763 = vperm.xlu0 %1394, %v1591_v19  }
  0x3c   :  { %212 = vperm.xlu2 %1398, %v1529_v9   ;;  %208 = vperm.xlu1 %1397, %v1501_v4  }
  0x43   :  { %778 = vperm.xlu0 %1394, %v1599_v20  }
  0x44   :  { %224 = vperm.xlu2 %1398, %v1547_v12   ;;  %220 = vperm.xlu1 %1397, %v1519_v7  }
  0x4b   :  { %793 = vperm.xlu0 %1394, %v1607_v21  }
  0x4c   :  { %236 = vperm.xlu2 %1398, %v1565_v15   ;;  %232 = vperm.xlu1 %1397, %v1537_v10  }
  0x53   :  { %808 = vperm.xlu0 %1394, %v1615_v22  }
  0x54   :  { %248 = vperm.xlu2 %1398, %v1573_v16   ;;  %244 = vperm.xlu1 %1397, %v1555_v13  }
  0x5b   :  { %1407 = vset.pattern.permute.xlu0 %v2573_v17 }
  0x5c   :  { %1400 = vset.pattern.permute.xlu2 %v2569_v23  ;;  %1399 = vset.pattern.permute.xlu1 %v2569_v23  ;;  %v1623_v24 = vpop.permute.xlu2 %80 }
  0x5d   :  { %196 = vperm.xlu0 %1407, %v1487_v2   ;;  %309 = vperm.xlu2 %1400, %v1487_v2  }
  0x5e   :  { %305 = vperm.xlu1 %1399, %v1511_v6  }
  0x64   :  { %v1628_v25 = vpop.permute.xlu2 %85 }
  0x65   :  { %216 = vperm.xlu0 %1407, %v1524_v8   ;;  %317 = vperm.xlu2 %1400, %v1482_v1  }
  0x66   :  { %313 = vperm.xlu1 %1399, %v1506_v5  }
  0x6c   :  { %v1633_v26 = vpop.permute.xlu2 %100 }
  0x6d   :  { %228 = vperm.xlu0 %1407, %v1542_v11   ;;  %329 = vperm.xlu2 %1400, %v1524_v8  }
  0x6e   :  { %325 = vperm.xlu1 %1399, %v1529_v9  }
  0x74   :  { %v1638_v27 = vpop.permute.xlu2 %115 }
  0x75   :  { %240 = vperm.xlu0 %1407, %v1560_v14   ;;  %v1641_v28 = vpop.permute.xlu1 %70  ;;  %341 = vperm.xlu2 %1400, %v1542_v11   ;;  %v1644_v29 = vpop.permute.xlu0 %60 }
  0x76   :  { %337 = vperm.xlu1 %1399, %v1547_v12  }
  0x7c   :  { %v1652_v31 = vpop.permute.xlu2 %130 }
  0x7d   :  { %870 = vperm.xlu0 %1407, %v1650_v30   ;;  %v1655_v32 = vpop.permute.xlu1 %75  ;;  %353 = vperm.xlu2 %1400, %v1560_v14   ;;  %v1658_v33 = vpop.permute.xlu0 %65 }
  0x7e   :  { %349 = vperm.xlu1 %1399, %v1565_v15  }
  0x85   :  { %890 = vperm.xlu0 %1407, %v1664_v34   ;;  %v1667_v35 = vpop.permute.xlu1 %95  ;;  %1401 = vset.pattern.permute.xlu2 %v2575_v36  ;;  %v91_v37 = vpop.permute.xlu0 %90 }
  0x86   :  { %361 = vperm.xlu1 %1399, %v1573_v16   ;;  %v1671_v38 = vpop.permute.xlu2 %192  ;;  %414 = vperm.xlu2 %1401, %v1492_v3   ;;  %v145_v46 = vsub.f32 %v91_v37, %v1693_v44 }
  0x87   :  { %v253_v17 = vsub.f32 %v1671_v38, %v1702_v47 }
  0x88   :  { %v161_v51 = vmul.f32 %v145_v46, %v145_v46 }
  0x8d   :  { %902 = vperm.xlu0 %1407, %v1677_v39   ;;  %v1680_v40 = vpop.permute.xlu1 %110  ;;  %v106_v41 = vpop.permute.xlu0 %105 }
  0x8e   :  { %1402 = vset.pattern.permute.xlu1 %v2575_v36  ;;  %v1688_v43 = vpop.permute.xlu2 %204  ;;  %426 = vperm.xlu2 %1401, %v1506_v5   ;;  %v148_v55 = vsub.f32 %v106_v41, %v1693_v44  ;;  %v141_v36 = vsub.f32 %v1641_v28, %v1693_v44 }
  0x8f   :  { %422 = vperm.xlu1 %1402, %v1487_v2  }
  0x90   :  { %v164_v60 = vmul.f32 %v148_v55, %v148_v55 }
  0x95   :  { %914 = vperm.xlu0 %1407, %v1698_v45   ;;  %v1705_v48 = vpop.permute.xlu1 %125  ;;  %v121_v49 = vpop.permute.xlu0 %120 }
  0x96   :  { %v213_v50 = vpop.permute.xlu2 %212  ;;  %434 = vperm.xlu2 %1401, %v1501_v4   ;;  %v151_v63 = vsub.f32 %v121_v49, %v1693_v44 }
  0x97   :  { %v258_v52 = vsub.f32 %v213_v50, %v1702_v47  ;;  %430 = vperm.xlu1 %1402, %v1482_v1  }
  0x99   :  { %v274_v53 = vmul.f32 %v258_v52, %v258_v52 }
  0x9b   :  { %v1716_v56 = vadd.f32 %v274_v53, %v161_v51  ;;  %v167_v51 = vmul.f32 %v151_v63, %v151_v63 }
  0x9d   :  { %926 = vperm.xlu0 %1407, %v1713_v54   ;;  %v136_v57 = vpop.permute.xlu0 %135 }
  0x9e   :  { %v225_v58 = vpop.permute.xlu2 %224  ;;  %446 = vperm.xlu2 %1401, %v1519_v7   ;;  %v1720_v59 = vpop.permute.xlu1 %188  ;;  %v154_v49 = vsub.f32 %v136_v57, %v1693_v44 }
  0x9f   :  { %v261_v61 = vsub.f32 %v225_v58, %v1702_v47  ;;  %442 = vperm.xlu1 %1402, %v1524_v8  }
  0xa1   :  { %v277_v62 = vmul.f32 %v261_v61, %v261_v61 }
  0xa3   :  { %v1725_v37 = vadd.f32 %v277_v62, %v164_v60  ;;  %v170_v62 = vmul.f32 %v154_v49, %v154_v49 }
  0xa5   :  { %1410 = vset.pattern.permute.xlu0 %v2569_v23  ;;  %v1728_v41 = vpop.permute.xlu0 %738 }
  0xa6   :  { %2587 = vst [vmem:[#allocation6_spill] sm:$0xff] %v1728_v41  ;;  %301 = vperm.xlu0 %1410, %v1492_v3   ;;  %v237_v46 = vpop.permute.xlu2 %236  ;;  %458 = vperm.xlu2 %1401, %v1537_v10   ;;  %v1732_v50 = vpop.permute.xlu1 %200  ;;  %v157_v41 = vmul.f32 %v141_v36, %v141_v36 }
  0xa7   :  { %v264_v52 = vsub.f32 %v237_v46, %v1702_v47  ;;  %454 = vperm.xlu1 %1402, %v1542_v11  }
  0xa9   :  { %v280_v53 = vmul.f32 %v264_v52, %v264_v52 }
  0xab   :  { %v1737_v55 = vadd.f32 %v280_v53, %v167_v51  ;;  %v2571_v51 = vmov 4  }
  0xad   :  { %v1739_v58 = vpop.permute.xlu0 %763 }
  0xae   :  { %2588 = vst [vmem:[#allocation7_spill] sm:$0xff] %v1739_v58  ;;  %321 = vperm.xlu0 %1410, %v1501_v4   ;;  %v249_v60 = vpop.permute.xlu2 %248  ;;  %470 = vperm.xlu2 %1401, %v1555_v13   ;;  %v1743_v61 = vpop.permute.xlu1 %208 }
  0xaf   :  { %v267_v63 = vsub.f32 %v249_v60, %v1702_v47  ;;  %466 = vperm.xlu1 %1402, %v1560_v14  }
  0xb1   :  { %v283_v46 = vmul.f32 %v267_v63, %v267_v63 }
  0xb3   :  { %v1747_v52 = vadd.f32 %v283_v46, %v170_v62 }
  0xb5   :  { %v1749_v57 = vpop.permute.xlu0 %778 }
  0xb6   :  { %2589 = vst [vmem:[#allocation8_spill] sm:$0xff] %v1749_v57  ;;  %333 = vperm.xlu0 %1410, %v1519_v7   ;;  %1404 = vset.pattern.permute.xlu2 %v2571_v51  ;;  %v1753_v53 = vpop.permute.xlu1 %220 }
  0xb7   :  { %1403 = vset.pattern.permute.xlu1 %v2571_v51  ;;  %v310_v23 = vpop.permute.xlu2 %309  ;;  %531 = vperm.xlu2 %1404, %v1511_v6  }
  0xb8   :  { %527 = vperm.xlu1 %1403, %v1492_v3   ;;  %v140_v3 = vsub.f32 %v1658_v33, %v1693_v44  ;;  %v269_v33 = vmul.f32 %v253_v17, %v253_v17  ;;  %v1797_v17 = vld [vmem:[%s2562_s4 + $0x38] sm:$0xff] }
  0xbd   :  { %v1758_v49 = vpop.permute.xlu0 %793 }
  0xbe   :  { %2590 = vst [vmem:[#allocation9_spill] sm:$0xff] %v1758_v49  ;;  %345 = vperm.xlu0 %1410, %v1537_v10   ;;  %v1761_v60 = vpop.permute.xlu1 %232 }
  0xbf   :  { %v1763_v62 = vpop.permute.xlu2 %317  ;;  %543 = vperm.xlu2 %1404, %v1482_v1   ;;  %v1781_v1 = vld [vmem:[%s2562_s4 + $0x10] sm:$0xff] }
  0xc0   :  { %539 = vperm.xlu1 %1403, %v1506_v5   ;;  %v1784_v5 = vperm.slane %v1685_v42, 2 }
  0xc2   :  { %v367_v0 = vsub.f32 %v310_v23, %v1784_v5 }
  0xc4   :  { %v383_v14 = vmul.f32 %v367_v0, %v367_v0 }
  0xc5   :  { %v1767_v63 = vpop.permute.xlu0 %808 }
  0xc6   :  { %2591 = vst [vmem:[#allocation10_spill] sm:$0xff] %v1767_v63  ;;  %357 = vperm.xlu0 %1410, %v1555_v13   ;;  %v1770_v46 = vpop.permute.xlu1 %244 }
  0xc7   :  { %v330_v51 = vpop.permute.xlu2 %329  ;;  %551 = vperm.xlu2 %1404, %v1529_v9  }
  0xc8   :  { %547 = vperm.xlu1 %1403, %v1501_v4   ;;  %v156_v4 = vmul.f32 %v140_v3, %v140_v3 }
  0xca   :  { %v285_v11 = vadd.f32 %v269_v33, %v156_v4 }
  0xce   :  { %987 = vperm.xlu0 %1410, %v1781_v1  }
  0xcf   :  { %v197_v63 = vpop.permute.xlu0 %196  ;;  %v342_v49 = vpop.permute.xlu2 %341  ;;  %563 = vperm.xlu2 %1404, %v1547_v12  }
  0xd0   :  { %v254_v38 = vsub.f32 %v197_v63, %v1702_v47  ;;  %559 = vperm.xlu1 %1403, %v1519_v7   ;;  %v306_v57 = vpop.permute.xlu1 %305  ;;  %v146_v63 = vsub.f32 %v1667_v35, %v1693_v44  ;;  %v1813_v35 = vld [vmem:[%s2562_s4 + $0x50] sm:$0xff] }
  0xd1   :  { %v366_v58 = vsub.f32 %v306_v57, %v1784_v5 }
  0xd2   :  { %v270_v28 = vmul.f32 %v254_v38, %v254_v38  ;;  %v149_v38 = vsub.f32 %v1680_v40, %v1693_v44 }
  0xd3   :  { %v382_v23 = vmul.f32 %v366_v58, %v366_v58  ;;  %v372_v58 = vsub.f32 %v330_v51, %v1784_v5 }
  0xd4   :  { %v286_v3 = vadd.f32 %v270_v28, %v157_v41 }
  0xd5   :  { %v1799_v8 = vadd.f32 %v382_v23, %v285_v11  ;;  %v162_v11 = vmul.f32 %v146_v63, %v146_v63 }
  0xd6   :  { %1007 = vperm.xlu0 %1410, %v1797_v17   ;;  %v1804_v7 = vadd.f32 %v383_v14, %v286_v3  ;;  %v388_v14 = vmul.f32 %v372_v58, %v372_v58  ;;  %v165_v58 = vmul.f32 %v149_v38, %v149_v38  ;;  %v1841_v38 = vperm.slane %v1685_v42, 3 }
  0xd7   :  { %2592 = vst [vmem:[#allocation11_spill] sm:$0xff] %v1799_v8  ;;  %v217_v36 = vpop.permute.xlu0 %216  ;;  %v354_v0 = vpop.permute.xlu2 %353  ;;  %575 = vperm.xlu2 %1404, %v1565_v15   ;;  %v2594_v8 = vmov 0  }
  0xd8   :  { %v259_v57 = vsub.f32 %v217_v36, %v1702_v47  ;;  %571 = vperm.xlu1 %1403, %v1537_v10   ;;  %v314_v41 = vpop.permute.xlu1 %313  ;;  %v375_v10 = vsub.f32 %v342_v49, %v1784_v5  ;;  %v255_v36 = vsub.f32 %v1732_v50, %v1702_v47 }
  0xda   :  { %v275_v4 = vmul.f32 %v259_v57, %v259_v57 }
  0xdc   :  { %v291_v33 = vadd.f32 %v275_v4, %v162_v11  ;;  %v142_v11 = vsub.f32 %v1655_v32, %v1693_v44  ;;  %v368_v4 = vsub.f32 %v314_v41, %v1784_v5  ;;  %v152_v32 = vsub.f32 %v1705_v48, %v1693_v44 }
  0xde   :  { %1019 = vperm.xlu0 %1410, %v1813_v35   ;;  %v1818_v51 = vadd.f32 %v388_v14, %v291_v33  ;;  %v391_v14 = vmul.f32 %v375_v10, %v375_v10  ;;  %v378_v10 = vsub.f32 %v354_v0, %v1784_v5 }
  0xdf   :  { %v229_v28 = vpop.permute.xlu0 %228  ;;  %587 = vperm.xlu2 %1404, %v1573_v16  }
  0xe0   :  { %v262_v23 = vsub.f32 %v229_v28, %v1702_v47  ;;  %583 = vperm.xlu1 %1403, %v1555_v13   ;;  %v326_v3 = vpop.permute.xlu1 %325  ;;  %v1824_v63 = vpop.permute.xlu2 %414  ;;  %v1835_v13 = vld [vmem:[%s2562_s4 + $0x68] sm:$0xff]  ;;  %v271_v28 = vmul.f32 %v255_v36, %v255_v36 }
  0xe1   :  { %v371_v40 = vsub.f32 %v326_v3, %v1784_v5  ;;  %v384_v3 = vmul.f32 %v368_v4, %v368_v4 }
  0xe2   :  { %v278_v57 = vmul.f32 %v262_v23, %v262_v23  ;;  %v158_v23 = vmul.f32 %v142_v11, %v142_v11  ;;  %v168_v11 = vmul.f32 %v152_v32, %v152_v32  ;;  %v1870_v32 = vld [vmem:[%s2562_s4 + $0x18] sm:$0xff] }
  0xe3   :  { %v387_v49 = vmul.f32 %v371_v40, %v371_v40 }
  0xe4   :  { %v294_v33 = vadd.f32 %v278_v57, %v165_v58  ;;  %v287_v48 = vadd.f32 %v271_v28, %v158_v23  ;;  %v1864_v28 = vld [vmem:[%s2562_s4 + $0x20] sm:$0xff]  ;;  %v2596_v23 = vmov 3  }
  0xe5   :  { %v1838_v50 = vadd.f32 %v387_v49, %v1716_v56 }
  0xe6   :  { %1031 = vperm.xlu0 %1410, %v1835_v13   ;;  %v1846_v41 = vadd.f32 %v391_v14, %v294_v33  ;;  %v400_v14 = vadd.f32 %v384_v3, %v287_v48 }
  0xe7   :  { %2593 = vst [vmem:[#allocation12_spill] sm:$0xff] %v1838_v50  ;;  %v241_v40 = vpop.permute.xlu0 %240  ;;  %1406 = vset.pattern.permute.xlu2 %v2594_v8  ;;  %v394_v50 = vmul.f32 %v378_v10, %v378_v10 }
  0xe8   :  { %v265_v56 = vsub.f32 %v241_v40, %v1702_v47  ;;  %1405 = vset.pattern.permute.xlu1 %v2594_v8  ;;  %v338_v36 = vpop.permute.xlu1 %337  ;;  %748 = vperm.xlu2 %1406, %v1781_v1   ;;  %v427_v58 = vpop.permute.xlu2 %426 }
  0xe9   :  { %v374_v57 = vsub.f32 %v338_v36, %v1784_v5  ;;  %v481_v49 = vsub.f32 %v427_v58, %v1841_v38  ;;  %743 = vperm.xlu1 %1405, %v1650_v30  }
  0xea   :  { %v281_v4 = vmul.f32 %v265_v56, %v265_v56 }
  0xeb   :  { %v390_v33 = vmul.f32 %v374_v57, %v374_v57  ;;  %v497_v0 = vmul.f32 %v481_v49, %v481_v49 }
  0xec   :  { %v297_v40 = vadd.f32 %v281_v4, %v168_v11 }
  0xed   :  { %v1857_v8 = vadd.f32 %v390_v33, %v1725_v37  ;;  %v1859_v2 = vadd.f32 %v497_v0, %v400_v14 }
  0xee   :  { %1413 = vset.pattern.permute.xlu0 %v2596_v23  ;;  %v1872_v3 = vadd.f32 %v394_v50, %v297_v40 }
  0xef   :  { %2595 = vst [vmem:[#allocation13_spill] sm:$0xff] %v1857_v8  ;;  %418 = vperm.xlu0 %1413, %v1511_v6   ;;  %v1875_v37 = vpop.permute.xlu0 %870 }
  0xf0   :  { %v350_v10 = vpop.permute.xlu1 %349  ;;  %758 = vperm.xlu2 %1406, %v1864_v28   ;;  %v1878_v56 = vpop.permute.xlu2 %434 }
  0xf1   :  { %v377_v36 = vsub.f32 %v350_v10, %v1784_v5  ;;  %753 = vperm.xlu1 %1405, %v1870_v32  }
  0xf3   :  { %v393_v58 = vmul.f32 %v377_v36, %v377_v36 }
  0xf5   :  { %v1883_v48 = vadd.f32 %v393_v58, %v1737_v55  ;;  %v256_v58 = vsub.f32 %v1688_v43, %v1702_v47  ;;  %v139_v43 = vsub.f32 %v1644_v29, %v1693_v44 }
  0xf7   :  { %2597 = vst [vmem:[#allocation14_spill] sm:$0xff] %v1883_v48  ;;  %438 = vperm.xlu0 %1413, %v1529_v9   ;;  %v1886_v50 = vpop.permute.xlu0 %890 }
  0xf8   :  { %v362_v6 = vpop.permute.xlu1 %361  ;;  %773 = vperm.xlu2 %1406, %v1797_v17   ;;  %v1889_v57 = vpop.permute.xlu2 %446 }
  0xf9   :  { %v380_v49 = vsub.f32 %v362_v6, %v1784_v5  ;;  %768 = vperm.xlu1 %1405, %v1664_v34  }
  0xfb   :  { %v396_v11 = vmul.f32 %v380_v49, %v380_v49  ;;  %v143_v49 = vsub.f32 %v1623_v24, %v1693_v44  ;;  %v1938_v24 = vperm.slane %v1685_v42, 4 }
  0xfd   :  { %v1894_v4 = vadd.f32 %v396_v11, %v1747_v52 }
  0xff   :  { %2598 = vst [vmem:[#allocation15_spill] sm:$0xff] %v1894_v4  ;;  %450 = vperm.xlu0 %1413, %v1547_v12   ;;  %v1897_v55 = vpop.permute.xlu0 %902  ;;  %v159_v4 = vmul.f32 %v143_v49, %v143_v49 }
 0x100   :  { %788 = vperm.xlu2 %1406, %v1813_v35   ;;  %v1900_v9 = vpop.permute.xlu2 %458 }
 0x101   :  { %783 = vperm.xlu1 %1405, %v1677_v39   ;;  %v423_v14 = vpop.permute.xlu1 %422 }
 0x102   :  { %v480_v33 = vsub.f32 %v423_v14, %v1841_v38  ;;  %v252_v14 = vsub.f32 %v1720_v59, %v1702_v47  ;;  %v478_v59 = vsub.f32 %v1824_v63, %v1841_v38 }
 0x104   :  { %v496_v0 = vmul.f32 %v480_v33, %v480_v33  ;;  %v272_v33 = vmul.f32 %v256_v58, %v256_v58 }
 0x106   :  { %v1905_v40 = vadd.f32 %v496_v0, %v1804_v7  ;;  %v2602_v7 = vmov 1   ;;  %v288_v29 = vadd.f32 %v272_v33, %v159_v4 }
 0x107   :  { %462 = vperm.xlu0 %1413, %v1565_v15   ;;  %v1908_v52 = vpop.permute.xlu0 %914 }
 0x108   :  { %2599 = vst [vmem:[#allocation16_spill] sm:$0xff] %v1905_v40  ;;  %803 = vperm.xlu2 %1406, %v1835_v13   ;;  %v1911_v12 = vpop.permute.xlu2 %470 }
 0x109   :  { %2600 = vst [vmem:[#allocation17_spill] sm:$0xff] %v1908_v52  ;;  %798 = vperm.xlu1 %1405, %v1698_v45   ;;  %v431_v10 = vpop.permute.xlu1 %430 }
 0x10a   :  { %v482_v0 = vsub.f32 %v431_v10, %v1841_v38 }
 0x10c   :  { %v498_v52 = vmul.f32 %v482_v0, %v482_v0 }
 0x10f   :  { %474 = vperm.xlu0 %1413, %v1573_v16   ;;  %v1915_v36 = vpop.permute.xlu0 %926  ;;  %v369_v16 = vsub.f32 %v1763_v62, %v1784_v5  ;;  %v155_v62 = vmul.f32 %v139_v43, %v139_v43 }
 0x110   :  { %2601 = vst [vmem:[#allocation18_spill] sm:$0xff] %v1915_v36  ;;  %1408 = vset.pattern.permute.xlu2 %v2602_v7 }
 0x111   :  { %813 = vperm.xlu1 %1405, %v1713_v54   ;;  %v443_v15 = vpop.permute.xlu1 %442  ;;  %866 = vperm.xlu2 %1408, %v1583_v18   ;;  %v1922_v6 = vpop.permute.xlu2 %531  ;;  %v385_v36 = vmul.f32 %v369_v16, %v369_v16  ;;  %v257_v16 = vsub.f32 %v1743_v61, %v1702_v47 }
 0x112   :  { %v485_v11 = vsub.f32 %v443_v15, %v1841_v38  ;;  %v268_v15 = vmul.f32 %v252_v14, %v252_v14  ;;  %v494_v14 = vmul.f32 %v478_v59, %v478_v59 }
 0x113   :  { %v401_v42 = vadd.f32 %v385_v36, %v288_v29  ;;  %v273_v29 = vmul.f32 %v257_v16, %v257_v16 }
 0x114   :  { %v501_v40 = vmul.f32 %v485_v11, %v485_v11  ;;  %v284_v4 = vadd.f32 %v268_v15, %v155_v62 }
 0x115   :  { %v514_v11 = vadd.f32 %v498_v52, %v401_v42  ;;  %v483_v52 = vsub.f32 %v1878_v56, %v1841_v38  ;;  %v260_v56 = vsub.f32 %v1753_v53, %v1702_v47 }
 0x116   :  { %v1935_v48 = vadd.f32 %v501_v40, %v1818_v51 }
 0x117   :  { %1092 = vperm.xlu0 %1413, %v1583_v18  }
 0x118   :  { %v302_v8 = vpop.permute.xlu0 %301 }
 0x119   :  { %v365_v10 = vsub.f32 %v302_v8, %v1784_v5  ;;  %1409 = vset.pattern.permute.xlu1 %v2602_v7  ;;  %v455_v58 = vpop.permute.xlu1 %454  ;;  %878 = vperm.xlu2 %1408, %v1870_v32   ;;  %v544_v51 = vpop.permute.xlu2 %543  ;;  %v144_v7 = vsub.f32 %v1628_v25, %v1693_v44  ;;  %v29_v25 = vld [vmem:[%s2564_s0 + $0x20] sm:$0xff] }
 0x11a   :  { %v488_v40 = vsub.f32 %v455_v58, %v1841_v38  ;;  %v595_v49 = vsub.f32 %v544_v51, %v1938_v24  ;;  %874 = vperm.xlu1 %1409, %v1781_v1  }
 0x11b   :  { %v381_v63 = vmul.f32 %v365_v10, %v365_v10  ;;  %v160_v61 = vmul.f32 %v144_v7, %v144_v7  ;;  %v276_v7 = vmul.f32 %v260_v56, %v260_v56 }
 0x11c   :  { %v504_v8 = vmul.f32 %v488_v40, %v488_v40  ;;  %v611_v43 = vmul.f32 %v595_v49, %v595_v49 }
 0x11d   :  { %v397_v33 = vadd.f32 %v381_v63, %v284_v4  ;;  %v289_v40 = vadd.f32 %v273_v29, %v160_v61  ;;  %v147_v63 = vsub.f32 %v1633_v26, %v1693_v44 }
 0x11e   :  { %v1954_v36 = vadd.f32 %v504_v8, %v1846_v41  ;;  %v627_v0 = vadd.f32 %v611_v43, %v514_v11  ;;  %v499_v11 = vmul.f32 %v483_v52, %v483_v52 }
 0x11f   :  { %1112 = vperm.xlu0 %1413, %v1591_v19   ;;  %v510_v62 = vadd.f32 %v494_v14, %v397_v33  ;;  %v163_v33 = vmul.f32 %v147_v63, %v147_v63 }
 0x120   :  { %v643_v15 = vsub.f32 1.0, %v627_v0  ;;  %v322_v58 = vpop.permute.xlu0 %321  ;;  %v486_v0 = vsub.f32 %v1889_v57, %v1841_v38 }
 0x121   :  { %v370_v59 = vsub.f32 %v322_v58, %v1784_v5  ;;  %v467_v10 = vpop.permute.xlu1 %466  ;;  %886 = vperm.xlu2 %1408, %v1591_v19   ;;  %v1964_v41 = vpop.permute.xlu2 %551  ;;  %v292_v58 = vadd.f32 %v276_v7, %v163_v33  ;;  %v153_v33 = vsub.f32 %v1652_v31, %v1693_v44 }
 0x122   :  { %v659_v51 = vmax.f32 %v643_v15, 0.0  ;;  %v491_v42 = vsub.f32 %v467_v10, %v1841_v38  ;;  %882 = vperm.xlu1 %1409, %v1864_v28   ;;  %v502_v57 = vmul.f32 %v486_v0, %v486_v0 }
 0x123   :  { %v386_v49 = vmul.f32 %v370_v59, %v370_v59 }
 0x124   :  { %v675_v4 = vmul.f32 %v659_v51, %v29_v25  ;;  %v507_v16 = vmul.f32 %v491_v42, %v491_v42  ;;  %v150_v25 = vsub.f32 %v1638_v27, %v1693_v44 }
 0x125   :  { %v402_v8 = vadd.f32 %v386_v49, %v289_v40  ;;  %v489_v49 = vsub.f32 %v1900_v9, %v1841_v38 }
 0x126   :  { %691 = vst [vmem:[%s2565_s6 + $0x20] sm:$0xff] %v675_v4  ;;  %v1976_v43 = vadd.f32 %v507_v16, %v1872_v3  ;;  %v263_v3 = vsub.f32 %v1761_v60, %v1702_v47  ;;  %v166_v60 = vmul.f32 %v150_v25, %v150_v25  ;;  %v492_v25 = vsub.f32 %v1911_v12, %v1841_v38 }
 0x127   :  { %1124 = vperm.xlu0 %1413, %v1599_v20   ;;  %v1979_v14 = vadd.f32 %v499_v11, %v402_v8  ;;  %v266_v8 = vsub.f32 %v1770_v46, %v1702_v47  ;;  %v505_v0 = vmul.f32 %v489_v49, %v489_v49 }
 0x128   :  { %v334_v53 = vpop.permute.xlu0 %333  ;;  %v279_v51 = vmul.f32 %v263_v3, %v263_v3  ;;  %v508_v12 = vmul.f32 %v492_v25, %v492_v25 }
 0x129   :  { %v373_v26 = vsub.f32 %v334_v53, %v1784_v5  ;;  %898 = vperm.xlu2 %1408, %v1599_v20   ;;  %v1985_v29 = vpop.permute.xlu2 %563 }
 0x12a   :  { %894 = vperm.xlu1 %1409, %v1797_v17   ;;  %v528_v15 = vpop.permute.xlu1 %527  ;;  %v295_v63 = vadd.f32 %v279_v51, %v166_v60 }
 0x12b   :  { %v389_v61 = vmul.f32 %v373_v26, %v373_v26  ;;  %v591_v52 = vsub.f32 %v528_v15, %v1938_v24 }
 0x12d   :  { %v405_v59 = vadd.f32 %v389_v61, %v292_v58  ;;  %v607_v10 = vmul.f32 %v591_v52, %v591_v52  ;;  %v282_v58 = vmul.f32 %v266_v8, %v266_v8  ;;  %v169_v52 = vmul.f32 %v153_v33, %v153_v33 }
 0x12f   :  { %v623_v42 = vadd.f32 %v607_v10, %v510_v62  ;;  %1136 = vperm.xlu0 %1413, %v1607_v21   ;;  %v1994_v40 = vadd.f32 %v502_v57, %v405_v59  ;;  %v25_v62 = vld [vmem:[%s2564_s0] sm:$0xff]  ;;  %v28_v59 = vld [vmem:[%s2564_s0 + $0x18] sm:$0xff]  ;;  %v298_v10 = vadd.f32 %v282_v58, %v169_v52  ;;  %v2606_v58 = vld [vmem:[#allocation3_spill] sm:$0xff] }
 0x130   :  { %v346_v56 = vpop.permute.xlu0 %345  ;;  %v33_v52 = vld [vmem:[%s2564_s0 + $0x40] sm:$0xff] }
 0x131   :  { %v639_v4 = vsub.f32 1.0, %v623_v42  ;;  %v376_v16 = vsub.f32 %v346_v56, %v1784_v5  ;;  %910 = vperm.xlu2 %1408, %v1607_v21   ;;  %v2000_v27 = vpop.permute.xlu2 %575 }
 0x132   :  { %906 = vperm.xlu1 %1409, %v1813_v35   ;;  %v540_v11 = vpop.permute.xlu1 %539 }
 0x133   :  { %v655_v7 = vmax.f32 %v639_v4, 0.0  ;;  %v392_v9 = vmul.f32 %v376_v16, %v376_v16  ;;  %v594_v53 = vsub.f32 %v540_v11, %v1938_v24  ;;  %v2603_v16 = vmov 4  }
 0x135   :  { %v671_v26 = vmul.f32 %v655_v7, %v25_v62  ;;  %v408_v3 = vadd.f32 %v392_v9, %v295_v63  ;;  %v610_v15 = vmul.f32 %v594_v53, %v594_v53  ;;  %v2604_v62 = vld [vmem:[#allocation2_spill] sm:$0xff]  ;;  %v2605_v7 = vmov 2   ;;  %v30_v9 = vld [vmem:[%s2564_s0 + $0x28] sm:$0xff] }
 0x137   :  { %687 = vst [vmem:[%s2565_s6] sm:$0xff] %v671_v26  ;;  %v626_v61 = vadd.f32 %v610_v15, %v1859_v2  ;;  %1148 = vperm.xlu0 %1413, %v1615_v22   ;;  %v521_v47 = vadd.f32 %v505_v0, %v408_v3 }
 0x138   :  { %v358_v46 = vpop.permute.xlu0 %357 }
 0x139   :  { %v642_v31 = vsub.f32 1.0, %v626_v61  ;;  %v379_v44 = vsub.f32 %v358_v46, %v1784_v5  ;;  %922 = vperm.xlu2 %1408, %v1615_v22   ;;  %v2020_v57 = vpop.permute.xlu2 %587 }
 0x13a   :  { %918 = vperm.xlu1 %1409, %v1835_v13   ;;  %v548_v2 = vpop.permute.xlu1 %547 }
 0x13b   :  { %v658_v51 = vmax.f32 %v642_v31, 0.0  ;;  %v395_v42 = vmul.f32 %v379_v44, %v379_v44  ;;  %v596_v60 = vsub.f32 %v548_v2, %v1938_v24 }
 0x13d   :  { %v674_v56 = vmul.f32 %v658_v51, %v28_v59  ;;  %v411_v49 = vadd.f32 %v395_v42, %v298_v10  ;;  %v612_v5 = vmul.f32 %v596_v60, %v596_v60  ;;  %v2607_v10 = vld [vmem:[#allocation4_spill] sm:$0xff]  ;;  %v36_v60 = vld [vmem:[%s2564_s0 + $0x58] sm:$0xff] }
 0x13f   :  { %690 = vst [vmem:[%s2565_s6 + $0x18] sm:$0xff] %v674_v56  ;;  %v628_v4 = vadd.f32 %v612_v5, %v1979_v14  ;;  %1416 = vset.pattern.permute.xlu0 %v2603_v16  ;;  %v524_v63 = vadd.f32 %v508_v12, %v411_v49 }
 0x140   :  { %535 = vperm.xlu0 %1416, %v2604_v62   ;;  %v2033_v11 = vpop.permute.xlu0 %987 }
 0x141   :  { %v644_v8 = vsub.f32 1.0, %v628_v4  ;;  %1412 = vset.pattern.permute.xlu2 %v2605_v7 }
 0x142   :  { %1411 = vset.pattern.permute.xlu1 %v2605_v7  ;;  %v560_v53 = vpop.permute.xlu1 %559  ;;  %983 = vperm.xlu2 %1412, %v1650_v30   ;;  %v2041_v14 = vpop.permute.xlu2 %748 }
 0x143   :  { %v660_v33 = vmax.f32 %v644_v8, 0.0  ;;  %v599_v0 = vsub.f32 %v560_v53, %v1938_v24  ;;  %979 = vperm.xlu1 %1411, %v1583_v18  }
 0x145   :  { %v676_v26 = vmul.f32 %v660_v33, %v30_v9  ;;  %v615_v3 = vmul.f32 %v599_v0, %v599_v0  ;;  %v2608_v9 = vld [vmem:[#allocation5_spill] sm:$0xff] }
 0x147   :  { %692 = vst [vmem:[%s2565_s6 + $0x28] sm:$0xff] %v676_v26  ;;  %v631_v15 = vadd.f32 %v615_v3, %v1994_v40  ;;  %v39_v26 = vld [vmem:[%s2564_s0 + $0x70] sm:$0xff] }
 0x148   :  { %555 = vperm.xlu0 %1416, %v2606_v58   ;;  %v2050_v61 = vpop.permute.xlu0 %1007 }
 0x149   :  { %v647_v46 = vsub.f32 1.0, %v631_v15 }
 0x14a   :  { %v572_v25 = vpop.permute.xlu1 %571  ;;  %995 = vperm.xlu2 %1412, %v1864_v28   ;;  %v2056_v18 = vpop.permute.xlu2 %758 }
 0x14b   :  { %v663_v31 = vmax.f32 %v647_v46, 0.0  ;;  %v602_v44 = vsub.f32 %v572_v25, %v1938_v24  ;;  %991 = vperm.xlu1 %1411, %v1870_v32  }
 0x14d   :  { %v679_v40 = vmul.f32 %v663_v31, %v33_v52  ;;  %v618_v59 = vmul.f32 %v602_v44, %v602_v44  ;;  %v592_v44 = vsub.f32 %v1922_v6, %v1938_v24 }
 0x14f   :  { %695 = vst [vmem:[%s2565_s6 + $0x40] sm:$0xff] %v679_v40  ;;  %v634_v2 = vadd.f32 %v618_v59, %v521_v47  ;;  %v2077_v47 = vld [vmem:[%s2566_s5] sm:$0x1f] }
 0x150   :  { %567 = vperm.xlu0 %1416, %v2607_v10   ;;  %v2064_v51 = vpop.permute.xlu0 %1019  ;;  %v2080_v8 = vperm.slane %v2077_v47, 1  ;;  %v2089_v33 = vperm.slane %v2077_v47, 0  ;;  %v608_v10 = vmul.f32 %v592_v44, %v592_v44 }
 0x151   :  { %v650_v42 = vsub.f32 1.0, %v634_v2 }
 0x152   :  { %v584_v12 = vpop.permute.xlu1 %583  ;;  %1003 = vperm.xlu2 %1412, %v1664_v34   ;;  %v2070_v56 = vpop.permute.xlu2 %773  ;;  %v931_v0 = vsub.f32 %v1875_v37, %v2080_v8  ;;  %v936_v6 = vsub.f32 %v1886_v50, %v2080_v8 }
 0x153   :  { %v666_v49 = vmax.f32 %v650_v42, 0.0  ;;  %v605_v5 = vsub.f32 %v584_v12, %v1938_v24  ;;  %999 = vperm.xlu1 %1411, %v1591_v19   ;;  %v2609_v42 = vld [vmem:[#allocation11_spill] sm:$0xff] }
 0x154   :  { %v947_v52 = vmul.f32 %v931_v0, %v931_v0 }
 0x155   :  { %v682_v4 = vmul.f32 %v666_v49, %v36_v60  ;;  %v621_v62 = vmul.f32 %v605_v5, %v605_v5  ;;  %v2610_v49 = vld [vmem:[#allocation6_spill] sm:$0xff] }
 0x156   :  { %v817_v5 = vsub.f32 %v2610_v49, %v2089_v33 }
 0x157   :  { %698 = vst [vmem:[%s2565_s6 + $0x58] sm:$0xff] %v682_v4  ;;  %v637_v7 = vadd.f32 %v621_v62, %v524_v63  ;;  %v597_v4 = vsub.f32 %v1964_v41, %v1938_v24 }
 0x158   :  { %579 = vperm.xlu0 %1416, %v2608_v9   ;;  %v2086_v53 = vpop.permute.xlu0 %1031  ;;  %v26_v9 = vld [vmem:[%s2564_s0 + $0x8] sm:$0xff] }
 0x159   :  { %v653_v19 = vsub.f32 1.0, %v637_v7 }
 0x15a   :  { %1015 = vperm.xlu2 %1412, %v1677_v39   ;;  %v2097_v3 = vpop.permute.xlu2 %788 }
 0x15b   :  { %v669_v63 = vmax.f32 %v653_v19, 0.0  ;;  %1011 = vperm.xlu1 %1411, %v1599_v20   ;;  %v744_v15 = vpop.permute.xlu1 %743 }
 0x15c   :  { %v818_v58 = vsub.f32 %v744_v15, %v2089_v33  ;;  %v952_v15 = vmul.f32 %v936_v6, %v936_v6  ;;  %v31_v6 = vld [vmem:[%s2564_s0 + $0x30] sm:$0xff] }
 0x15d   :  { %v685_v46 = vmul.f32 %v669_v63, %v39_v26  ;;  %v833_v63 = vmul.f32 %v817_v5, %v817_v5 }
 0x15e   :  { %v834_v25 = vmul.f32 %v818_v58, %v818_v58  ;;  %v613_v58 = vmul.f32 %v597_v4, %v597_v4 }
 0x15f   :  { %701 = vst [vmem:[%s2565_s6 + $0x70] sm:$0xff] %v685_v46 }
 0x160   :  { %v2104_v37 = vadd.f32 %v947_v52, %v834_v25  ;;  %1209 = vperm.xlu0 %1416, %v1650_v30   ;;  %v2611_v52 = vld [vmem:[#allocation12_spill] sm:$0xff] }
 0x161   :  { %v419_v31 = vpop.permute.xlu0 %418 }
 0x162   :  { %v479_v20 = vsub.f32 %v419_v31, %v1841_v38  ;;  %1027 = vperm.xlu2 %1412, %v1698_v45   ;;  %v2111_v40 = vpop.permute.xlu2 %803 }
 0x163   :  { %1023 = vperm.xlu1 %1411, %v1607_v21   ;;  %v754_v59 = vpop.permute.xlu1 %753 }
 0x164   :  { %v495_v2 = vmul.f32 %v479_v20, %v479_v20 }
 0x166   :  { %v511_v60 = vadd.f32 %v495_v2, %v2609_v42  ;;  %v600_v42 = vsub.f32 %v1985_v29, %v1938_v24 }
 0x168   :  { %v624_v12 = vadd.f32 %v608_v10, %v511_v60  ;;  %1229 = vperm.xlu0 %1416, %v1664_v34   ;;  %v939_v10 = vsub.f32 %v1897_v55, %v2080_v8  ;;  %v820_v60 = vsub.f32 %v754_v59, %v2089_v33 }
 0x169   :  { %v439_v62 = vpop.permute.xlu0 %438 }
 0x16a   :  { %v640_v7 = vsub.f32 1.0, %v624_v12  ;;  %v484_v21 = vsub.f32 %v439_v62, %v1841_v38  ;;  %1039 = vperm.xlu2 %1412, %v1713_v54  }
 0x16b   :  { %1035 = vperm.xlu1 %1411, %v1615_v22   ;;  %v769_v34 = vpop.permute.xlu1 %768  ;;  %v867_v19 = vpop.permute.xlu2 %866 }
 0x16c   :  { %v656_v0 = vmax.f32 %v640_v7, 0.0  ;;  %v500_v26 = vmul.f32 %v484_v21, %v484_v21  ;;  %v823_v50 = vsub.f32 %v769_v34, %v2089_v33  ;;  %v930_v41 = vsub.f32 %v867_v19, %v2080_v8  ;;  %v2612_v19 = vld [vmem:[#allocation13_spill] sm:$0xff] }
 0x16d   :  { %v955_v7 = vmul.f32 %v939_v10, %v939_v10  ;;  %v616_v21 = vmul.f32 %v600_v42, %v600_v42 }
 0x16e   :  { %v672_v46 = vmul.f32 %v656_v0, %v26_v9  ;;  %v516_v25 = vadd.f32 %v500_v26, %v2611_v52  ;;  %v839_v31 = vmul.f32 %v823_v50, %v823_v50  ;;  %v946_v44 = vmul.f32 %v930_v41, %v930_v41 }
 0x16f   :  { %v836_v9 = vmul.f32 %v820_v60, %v820_v60 }
 0x170   :  { %688 = vst [vmem:[%s2565_s6 + $0x8] sm:$0xff] %v672_v46  ;;  %v629_v22 = vadd.f32 %v613_v58, %v516_v25  ;;  %v2134_v20 = vadd.f32 %v952_v15, %v839_v31  ;;  %v2136_v2 = vadd.f32 %v946_v44, %v833_v63  ;;  %1241 = vperm.xlu0 %1416, %v1677_v39   ;;  %v2614_v15 = vld [vmem:[#allocation17_spill] sm:$0xff]  ;;  %v34_v44 = vld [vmem:[%s2564_s0 + $0x48] sm:$0xff] }
 0x171   :  { %v451_v12 = vpop.permute.xlu0 %450  ;;  %v942_v58 = vsub.f32 %v2614_v15, %v2080_v8  ;;  %v603_v46 = vsub.f32 %v2000_v27, %v1938_v24 }
 0x172   :  { %v645_v49 = vsub.f32 1.0, %v629_v22  ;;  %v487_v5 = vsub.f32 %v451_v12, %v1841_v38  ;;  %1415 = vset.pattern.permute.xlu2 %v2596_v23 }
 0x173   :  { %1414 = vset.pattern.permute.xlu1 %v2596_v23  ;;  %v784_v39 = vpop.permute.xlu1 %783  ;;  %1100 = vperm.xlu2 %1415, %v1781_v1   ;;  %v879_v55 = vpop.permute.xlu2 %878 }
 0x174   :  { %v661_v4 = vmax.f32 %v645_v49, 0.0  ;;  %v503_v29 = vmul.f32 %v487_v5, %v487_v5  ;;  %v826_v59 = vsub.f32 %v784_v39, %v2089_v33  ;;  %v933_v62 = vsub.f32 %v879_v55, %v2080_v8  ;;  %1096 = vperm.xlu1 %1414, %v1650_v30   ;;  %v2613_v30 = vld [vmem:[#allocation7_spill] sm:$0xff]  ;;  %v2615_v39 = vld [vmem:[#allocation14_spill] sm:$0xff] }
 0x175   :  { %v822_v63 = vsub.f32 %v2613_v30, %v2089_v33  ;;  %v958_v49 = vmul.f32 %v942_v58, %v942_v58  ;;  %v619_v5 = vmul.f32 %v603_v46, %v603_v46  ;;  %v37_v30 = vld [vmem:[%s2564_s0 + $0x60] sm:$0xff] }
 0x176   :  { %v677_v34 = vmul.f32 %v661_v4, %v31_v6  ;;  %v519_v0 = vadd.f32 %v503_v29, %v2612_v19  ;;  %v842_v26 = vmul.f32 %v826_v59, %v826_v59  ;;  %v949_v23 = vmul.f32 %v933_v62, %v933_v62 }
 0x177   :  { %v838_v27 = vmul.f32 %v822_v63, %v822_v63 }
 0x178   :  { %693 = vst [vmem:[%s2565_s6 + $0x30] sm:$0xff] %v677_v34  ;;  %v632_v1 = vadd.f32 %v616_v21, %v519_v0  ;;  %v2158_v50 = vadd.f32 %v955_v7, %v842_v26  ;;  %v2160_v41 = vadd.f32 %v949_v23, %v836_v9  ;;  %1253 = vperm.xlu0 %1416, %v1698_v45   ;;  %v2616_v21 = vld [vmem:[#allocation8_spill] sm:$0xff]  ;;  %v2617_v34 = vld [vmem:[#allocation18_spill] sm:$0xff] }
 0x179   :  { %v463_v52 = vpop.permute.xlu0 %462  ;;  %v825_v9 = vsub.f32 %v2616_v21, %v2089_v33  ;;  %v945_v19 = vsub.f32 %v2617_v34, %v2080_v8  ;;  %v606_v0 = vsub.f32 %v2020_v57, %v1938_v24  ;;  %v1419_v57 = vld [vmem:[%s2562_s4 + $0x30] sm:$0xff] }
 0x17a   :  { %v648_v25 = vsub.f32 1.0, %v632_v1  ;;  %v490_v31 = vsub.f32 %v463_v52, %v1841_v38 }
 0x17b   :  { %v799_v22 = vpop.permute.xlu1 %798  ;;  %1108 = vperm.xlu2 %1415, %v1864_v28   ;;  %v887_v45 = vpop.permute.xlu2 %886 }
 0x17c   :  { %v664_v10 = vmax.f32 %v648_v25, 0.0  ;;  %v506_v42 = vmul.f32 %v490_v31, %v490_v31  ;;  %v829_v60 = vsub.f32 %v799_v22, %v2089_v33  ;;  %v935_v12 = vsub.f32 %v887_v45, %v2080_v8  ;;  %1104 = vperm.xlu1 %1414, %v1870_v32   ;;  %v2618_v22 = vld [vmem:[#allocation15_spill] sm:$0xff] }
 0x17d   :  { %v961_v25 = vmul.f32 %v945_v19, %v945_v19  ;;  %v622_v31 = vmul.f32 %v606_v0, %v606_v0 }
 0x17e   :  { %v680_v6 = vmul.f32 %v664_v10, %v34_v44  ;;  %v522_v55 = vadd.f32 %v506_v42, %v2615_v39  ;;  %v845_v4 = vmul.f32 %v829_v60, %v829_v60  ;;  %v951_v29 = vmul.f32 %v935_v12, %v935_v12 }
 0x180   :  { %696 = vst [vmem:[%s2565_s6 + $0x48] sm:$0xff] %v680_v6  ;;  %v635_v59 = vadd.f32 %v619_v5, %v522_v55  ;;  %v2181_v62 = vadd.f32 %v958_v49, %v845_v4  ;;  %v2183_v7 = vadd.f32 %v951_v29, %v838_v27  ;;  %1265 = vperm.xlu0 %1416, %v1713_v54   ;;  %v2211_v27 = vperm.slane %v2077_v47, 2  ;;  %v2619_v5 = vld [vmem:[#allocation9_spill] sm:$0xff] }
 0x181   :  { %v475_v26 = vpop.permute.xlu0 %474  ;;  %v828_v6 = vsub.f32 %v2619_v5, %v2089_v33  ;;  %v819_v55 = vsub.f32 %v2041_v14, %v2089_v33  ;;  %v40_v4 = vld [vmem:[%s2564_s0 + $0x78] sm:$0xff]  ;;  %v824_v5 = vsub.f32 %v2070_v56, %v2089_v33 }
 0x182   :  { %v651_v23 = vsub.f32 1.0, %v635_v59  ;;  %v493_v1 = vsub.f32 %v475_v26, %v1841_v38  ;;  %v841_v38 = vmul.f32 %v825_v9, %v825_v9  ;;  %v1420_v9 = vld [vmem:[%s2562_s4 + $0x48] sm:$0xff]  ;;  %v1045_v19 = vsub.f32 %v2033_v11, %v2211_v27 }
 0x183   :  { %v814_v63 = vpop.permute.xlu1 %813  ;;  %1120 = vperm.xlu2 %1415, %v1797_v17   ;;  %v899_v54 = vpop.permute.xlu2 %898  ;;  %v844_v0 = vmul.f32 %v828_v6, %v828_v6  ;;  %v1422_v6 = vld [vmem:[%s2562_s4 + $0x78] sm:$0xff] }
 0x184   :  { %v667_v15 = vmax.f32 %v651_v23, 0.0  ;;  %v509_v58 = vmul.f32 %v493_v1, %v493_v1  ;;  %v832_v46 = vsub.f32 %v814_v63, %v2089_v33  ;;  %v938_v52 = vsub.f32 %v899_v54, %v2080_v8  ;;  %1116 = vperm.xlu1 %1414, %v1419_v57  }
 0x185   :  { %v835_v1 = vmul.f32 %v819_v55, %v819_v55  ;;  %v1061_v63 = vmul.f32 %v1045_v19, %v1045_v19  ;;  %v1423_v55 = vld [vmem:[%s2562_s4] sm:$0xff] }
 0x186   :  { %v683_v44 = vmul.f32 %v667_v15, %v37_v30  ;;  %v525_v45 = vadd.f32 %v509_v58, %v2618_v22  ;;  %v848_v10 = vmul.f32 %v832_v46, %v832_v46  ;;  %v954_v17 = vmul.f32 %v938_v52, %v938_v52  ;;  %v2620_v58 = vld [vmem:[#allocation10_spill] sm:$0xff] }
 0x187   :  { %v831_v11 = vsub.f32 %v2620_v58, %v2089_v33  ;;  %v821_v46 = vsub.f32 %v2056_v18, %v2089_v33  ;;  %v1424_v58 = vld [vmem:[%s2562_s4 + $0x10] sm:$0xff] }
 0x188   :  { %699 = vst [vmem:[%s2565_s6 + $0x60] sm:$0xff] %v683_v44  ;;  %v638_v42 = vadd.f32 %v622_v31, %v525_v45  ;;  %v2206_v60 = vadd.f32 %v961_v25, %v848_v10  ;;  %v2208_v12 = vadd.f32 %v954_v17, %v841_v38  ;;  %v1421_v25 = vld [vmem:[%s2562_s4 + $0x60] sm:$0xff] }
 0x189   :  { %v2213_v49 = vpop.permute.xlu0 %1092  ;;  %v847_v22 = vmul.f32 %v831_v11, %v831_v11  ;;  %v837_v10 = vmul.f32 %v821_v46, %v821_v46 }
 0x18a   :  { %v654_v39 = vsub.f32 1.0, %v638_v42 }
 0x18b   :  { %1132 = vperm.xlu2 %1415, %v1813_v35   ;;  %v911_v29 = vpop.permute.xlu2 %910 }
 0x18c   :  { %v670_v59 = vmax.f32 %v654_v39, 0.0  ;;  %v941_v21 = vsub.f32 %v911_v29, %v2080_v8  ;;  %1128 = vperm.xlu1 %1414, %v1420_v9   ;;  %v875_v34 = vpop.permute.xlu1 %874  ;;  %v1050_v29 = vsub.f32 %v2050_v61, %v2211_v27 }
 0x18d   :  { %v932_v14 = vsub.f32 %v875_v34, %v2080_v8 }
 0x18e   :  { %v686_v26 = vmul.f32 %v670_v59, %v40_v4  ;;  %v957_v23 = vmul.f32 %v941_v21, %v941_v21  ;;  %v840_v21 = vmul.f32 %v824_v5, %v824_v5  ;;  %v1066_v19 = vmul.f32 %v1050_v29, %v1050_v29 }
 0x18f   :  { %v948_v35 = vmul.f32 %v932_v14, %v932_v14 }
 0x190   :  { %702 = vst [vmem:[%s2565_s6 + $0x78] sm:$0xff] %v686_v26  ;;  %v2233_v30 = vadd.f32 %v957_v23, %v844_v0  ;;  %v827_v23 = vsub.f32 %v2097_v3, %v2089_v33 }
 0x191   :  { %v964_v54 = vadd.f32 %v948_v35, %v835_v1  ;;  %v2235_v15 = vpop.permute.xlu0 %1112 }
 0x192   :  { %v843_v3 = vmul.f32 %v827_v23, %v827_v23 }
 0x193   :  { %1144 = vperm.xlu2 %1415, %v1835_v13   ;;  %v923_v52 = vpop.permute.xlu2 %922  ;;  %v2242_v57 = vadd.f32 %v1061_v63, %v964_v54  ;;  %v1053_v63 = vsub.f32 %v2064_v51, %v2211_v27  ;;  %v830_v51 = vsub.f32 %v2111_v40, %v2089_v33 }
 0x194   :  { %v944_v38 = vsub.f32 %v923_v52, %v2080_v8  ;;  %1140 = vperm.xlu1 %1414, %v1421_v25   ;;  %v883_v31 = vpop.permute.xlu1 %882 }
 0x195   :  { %v934_v44 = vsub.f32 %v883_v31, %v2080_v8 }
 0x196   :  { %v960_v45 = vmul.f32 %v944_v38, %v944_v38 }
 0x197   :  { %v950_v17 = vmul.f32 %v934_v44, %v934_v44  ;;  %v1425_v44 = vld [vmem:[%s2562_s4 + $0x28] sm:$0xff] }
 0x198   :  { %v2249_v18 = vadd.f32 %v960_v45, %v847_v22  ;;  %v1056_v45 = vsub.f32 %v2086_v53, %v2211_v27 }
 0x199   :  { %v966_v13 = vadd.f32 %v950_v17, %v837_v10  ;;  %v2251_v42 = vpop.permute.xlu0 %1124 }
 0x19a   :  { %v1072_v5 = vmul.f32 %v1056_v45, %v1056_v45 }
 0x19b   :  { %1417 = vset.pattern.permute.xlu2 %v2603_v16 }
 0x19c   :  { %1152 = vperm.xlu1 %1414, %v1422_v6   ;;  %v895_v39 = vpop.permute.xlu1 %894  ;;  %1205 = vperm.xlu2 %1417, %v1423_v55   ;;  %v984_v4 = vpop.permute.xlu2 %983  ;;  %v2304_v55 = vperm.slane %v2077_v47, 3 }
 0x19d   :  { %v937_v59 = vsub.f32 %v895_v39, %v2080_v8  ;;  %v1044_v56 = vsub.f32 %v984_v4, %v2211_v27 }
 0x19f   :  { %v953_v9 = vmul.f32 %v937_v59, %v937_v59  ;;  %v1060_v34 = vmul.f32 %v1044_v56, %v1044_v56 }
 0x1a1   :  { %v969_v14 = vadd.f32 %v953_v9, %v840_v21  ;;  %v2267_v0 = vadd.f32 %v1060_v34, %v2104_v37  ;;  %v2269_v26 = vpop.permute.xlu0 %1136  ;;  %v1156_v9 = vsub.f32 %v2213_v49, %v2304_v55 }
 0x1a3   :  { %v2273_v1 = vadd.f32 %v1066_v19, %v969_v14  ;;  %v2621_v19 = vld [vmem:[#allocation16_spill] sm:$0xff] }
 0x1a4   :  { %1418 = vset.pattern.permute.xlu1 %v2603_v16  ;;  %v907_v61 = vpop.permute.xlu1 %906  ;;  %1217 = vperm.xlu2 %1417, %v1870_v32   ;;  %v996_v35 = vpop.permute.xlu2 %995  ;;  %v1069_v16 = vmul.f32 %v1053_v63, %v1053_v63 }
 0x1a5   :  { %v940_v54 = vsub.f32 %v907_v61, %v2080_v8  ;;  %v1047_v37 = vsub.f32 %v996_v35, %v2211_v27  ;;  %1213 = vperm.xlu1 %1418, %v1424_v58  }
 0x1a7   :  { %v956_v11 = vmul.f32 %v940_v54, %v940_v54  ;;  %v1063_v46 = vmul.f32 %v1047_v37, %v1047_v37  ;;  %v1172_v54 = vmul.f32 %v1156_v9, %v1156_v9  ;;  %v27_v37 = vld [vmem:[%s2564_s0 + $0x10] sm:$0xff] }
 0x1a9   :  { %v972_v52 = vadd.f32 %v956_v11, %v843_v3  ;;  %v2284_v38 = vadd.f32 %v1063_v46, %v966_v13  ;;  %v2286_v32 = vpop.permute.xlu0 %1148  ;;  %v846_v13 = vmul.f32 %v830_v51, %v830_v51  ;;  %v1428_v46 = vld [vmem:[%s2562_s4 + $0x58] sm:$0xff] }
 0x1ab   :  { %v2290_v25 = vadd.f32 %v1069_v16, %v972_v52 }
 0x1ac   :  { %v919_v31 = vpop.permute.xlu1 %918  ;;  %1225 = vperm.xlu2 %1417, %v1425_v44   ;;  %v1004_v22 = vpop.permute.xlu2 %1003 }
 0x1ad   :  { %v943_v10 = vsub.f32 %v919_v31, %v2080_v8  ;;  %v1049_v17 = vsub.f32 %v1004_v22, %v2211_v27  ;;  %1221 = vperm.xlu1 %1418, %v1864_v28   ;;  %v1426_v28 = vld [vmem:[%s2562_s4 + $0x40] sm:$0xff] }
 0x1af   :  { %v959_v33 = vmul.f32 %v943_v10, %v943_v10  ;;  %v1065_v40 = vmul.f32 %v1049_v17, %v1049_v17 }
 0x1b1   :  { %v975_v6 = vadd.f32 %v959_v33, %v846_v13  ;;  %v2301_v39 = vadd.f32 %v1065_v40, %v2134_v20  ;;  %v1427_v20 = vld [vmem:[%s2562_s4 + $0x38] sm:$0xff] }
 0x1b2   :  { %v536_v4 = vpop.permute.xlu0 %535  ;;  %v32_v13 = vld [vmem:[%s2564_s0 + $0x38] sm:$0xff] }
 0x1b3   :  { %v593_v53 = vsub.f32 %v536_v4, %v1938_v24  ;;  %v2307_v29 = vadd.f32 %v1072_v5, %v975_v6  ;;  %v1430_v6 = vld [vmem:[%s2562_s4 + $0x70] sm:$0xff] }
 0x1b4   :  { %1237 = vperm.xlu2 %1417, %v1426_v28   ;;  %v1016_v8 = vpop.permute.xlu2 %1015 }
 0x1b5   :  { %v609_v59 = vmul.f32 %v593_v53, %v593_v53  ;;  %v1052_v56 = vsub.f32 %v1016_v8, %v2211_v27  ;;  %1233 = vperm.xlu1 %1418, %v1427_v20   ;;  %v980_v21 = vpop.permute.xlu1 %979 }
 0x1b6   :  { %v1043_v34 = vsub.f32 %v980_v21, %v2211_v27 }
 0x1b7   :  { %v625_v14 = vadd.f32 %v609_v59, %v2621_v19  ;;  %v1068_v23 = vmul.f32 %v1052_v56, %v1052_v56  ;;  %v1161_v59 = vsub.f32 %v2235_v15, %v2304_v55 }
 0x1b8   :  { %v1059_v61 = vmul.f32 %v1043_v34, %v1043_v34 }
 0x1b9   :  { %v641_v35 = vsub.f32 1.0, %v625_v14  ;;  %v2321_v63 = vadd.f32 %v1068_v23, %v2158_v50  ;;  %v1177_v14 = vmul.f32 %v1161_v59, %v1161_v59  ;;  %v35_v23 = vld [vmem:[%s2564_s0 + $0x50] sm:$0xff] }
 0x1ba   :  { %v1075_v58 = vadd.f32 %v1059_v61, %v2136_v2  ;;  %v556_v3 = vpop.permute.xlu0 %555  ;;  %v1429_v2 = vld [vmem:[%s2562_s4 + $0x50] sm:$0xff] }
 0x1bb   :  { %v657_v11 = vmax.f32 %v641_v35, 0.0  ;;  %v598_v49 = vsub.f32 %v556_v3, %v1938_v24 }
 0x1bc   :  { %1249 = vperm.xlu2 %1417, %v1428_v46   ;;  %v1028_v16 = vpop.permute.xlu2 %1027  ;;  %v2331_v52 = vadd.f32 %v1172_v54, %v1075_v58 }
 0x1bd   :  { %v673_v50 = vmul.f32 %v657_v11, %v27_v37  ;;  %v614_v51 = vmul.f32 %v598_v49, %v598_v49  ;;  %v1055_v31 = vsub.f32 %v1028_v16, %v2211_v27  ;;  %1245 = vperm.xlu1 %1418, %v1429_v2   ;;  %v2337_v44 = vpop.permute.xlu1 %991 }
 0x1bf   :  { %689 = vst [vmem:[%s2565_s6 + $0x10] sm:$0xff] %v673_v50  ;;  %v630_v22 = vadd.f32 %v614_v51, %v1935_v48  ;;  %v1071_v45 = vmul.f32 %v1055_v31, %v1055_v31  ;;  %v38_v31 = vld [vmem:[%s2564_s0 + $0x68] sm:$0xff] }
 0x1c1   :  { %v646_v10 = vsub.f32 1.0, %v630_v22  ;;  %v2344_v17 = vadd.f32 %v1071_v45, %v2181_v62  ;;  %v1431_v62 = vld [vmem:[%s2562_s4 + $0x68] sm:$0xff] }
 0x1c2   :  { %v568_v33 = vpop.permute.xlu0 %567 }
 0x1c3   :  { %v662_v40 = vmax.f32 %v646_v10, 0.0  ;;  %v601_v5 = vsub.f32 %v568_v33, %v1938_v24 }
 0x1c4   :  { %1261 = vperm.xlu2 %1417, %v1430_v6   ;;  %v1040_v4 = vpop.permute.xlu2 %1039 }
 0x1c5   :  { %v678_v48 = vmul.f32 %v662_v40, %v32_v13  ;;  %v617_v53 = vmul.f32 %v601_v5, %v601_v5  ;;  %v1058_v28 = vsub.f32 %v1040_v4, %v2211_v27  ;;  %1257 = vperm.xlu1 %1418, %v1431_v62   ;;  %v1000_v8 = vpop.permute.xlu1 %999  ;;  %v1170_v62 = vsub.f32 %v2286_v32, %v2304_v55 }
 0x1c6   :  { %v1048_v56 = vsub.f32 %v1000_v8, %v2211_v27 }
 0x1c7   :  { %694 = vst [vmem:[%s2565_s6 + $0x38] sm:$0xff] %v678_v48  ;;  %v633_v20 = vadd.f32 %v617_v53, %v1954_v36  ;;  %v1074_v21 = vmul.f32 %v1058_v28, %v1058_v28 }
 0x1c8   :  { %v1064_v9 = vmul.f32 %v1048_v56, %v1048_v56 }
 0x1c9   :  { %v649_v34 = vsub.f32 1.0, %v633_v20  ;;  %v2365_v19 = vadd.f32 %v1074_v21, %v2206_v60  ;;  %v1164_v60 = vsub.f32 %v2251_v42, %v2304_v55  ;;  %v2409_v21 = vperm.slane %v2077_v47, 4 }
 0x1ca   :  { %v1080_v15 = vadd.f32 %v1064_v9, %v2183_v7  ;;  %v580_v61 = vpop.permute.xlu0 %579 }
 0x1cb   :  { %v665_v35 = vmax.f32 %v649_v34, 0.0  ;;  %v604_v54 = vsub.f32 %v580_v61, %v1938_v24  ;;  %v1180_v51 = vmul.f32 %v1164_v60, %v1164_v60 }
 0x1cc   :  { %v2372_v37 = vadd.f32 %v1177_v14, %v1080_v15 }
 0x1cd   :  { %v681_v36 = vmul.f32 %v665_v35, %v35_v23  ;;  %v620_v58 = vmul.f32 %v604_v54, %v604_v54  ;;  %v1012_v3 = vpop.permute.xlu1 %1011  ;;  %v1101_v11 = vpop.permute.xlu2 %1100 }
 0x1ce   :  { %v1051_v49 = vsub.f32 %v1012_v3, %v2211_v27  ;;  %v1158_v46 = vsub.f32 %v1101_v11, %v2304_v55 }
 0x1cf   :  { %697 = vst [vmem:[%s2565_s6 + $0x50] sm:$0xff] %v681_v36  ;;  %v636_v7 = vadd.f32 %v620_v58, %v1976_v43  ;;  %v1167_v43 = vsub.f32 %v2269_v26, %v2304_v55 }
 0x1d0   :  { %v1067_v24 = vmul.f32 %v1051_v49, %v1051_v49  ;;  %v1174_v16 = vmul.f32 %v1158_v46, %v1158_v46 }
 0x1d1   :  { %v652_v50 = vsub.f32 1.0, %v636_v7  ;;  %v1183_v6 = vmul.f32 %v1167_v43, %v1167_v43  ;;  %v704_v7 = vld [vmem:[%s2567_s1 + $0x8] sm:$0xff] }
 0x1d2   :  { %v1083_v42 = vadd.f32 %v1067_v24, %v2208_v12  ;;  %v2387_v2 = vadd.f32 %v1174_v16, %v2242_v57  ;;  %v1210_v34 = vpop.permute.xlu0 %1209 }
 0x1d3   :  { %v668_v22 = vmax.f32 %v652_v50, 0.0  ;;  %v1270_v32 = vsub.f32 %v1210_v34, %v2409_v21 }
 0x1d4   :  { %v2389_v45 = vadd.f32 %v1180_v51, %v1083_v42 }
 0x1d5   :  { %v684_v10 = vmul.f32 %v668_v22, %v38_v31  ;;  %v1024_v13 = vpop.permute.xlu1 %1023  ;;  %v1109_v33 = vpop.permute.xlu2 %1108  ;;  %v1286_v47 = vmul.f32 %v1270_v32, %v1270_v32 }
 0x1d6   :  { %v1054_v40 = vsub.f32 %v1024_v13, %v2211_v27  ;;  %v1160_v5 = vsub.f32 %v1109_v33, %v2304_v55 }
 0x1d7   :  { %700 = vst [vmem:[%s2565_s6 + $0x68] sm:$0xff] %v684_v10 }
 0x1d8   :  { %v1070_v12 = vmul.f32 %v1054_v40, %v1054_v40  ;;  %v1176_v57 = vmul.f32 %v1160_v5, %v1160_v5 }
 0x1da   :  { %v1086_v4 = vadd.f32 %v1070_v12, %v2233_v30  ;;  %v2400_v48 = vadd.f32 %v1176_v57, %v2284_v38  ;;  %v1186_v30 = vmul.f32 %v1170_v62, %v1170_v62 }
 0x1dc   :  { %v2402_v53 = vadd.f32 %v1183_v6, %v1086_v4 }
 0x1dd   :  { %v1036_v28 = vpop.permute.xlu1 %1035  ;;  %v1121_v26 = vpop.permute.xlu2 %1120 }
 0x1de   :  { %v1057_v8 = vsub.f32 %v1036_v28, %v2211_v27  ;;  %v1163_v59 = vsub.f32 %v1121_v26, %v2304_v55  ;;  %v703_v26 = vld [vmem:[%s2567_s1] sm:$0xff] }
 0x1e0   :  { %v1073_v56 = vmul.f32 %v1057_v8, %v1057_v8  ;;  %v1179_v20 = vmul.f32 %v1163_v59, %v1163_v59 }
 0x1e2   :  { %v1089_v38 = vadd.f32 %v1073_v56, %v2249_v18  ;;  %v2413_v9 = vadd.f32 %v1179_v20, %v2273_v1  ;;  %v1230_v1 = vpop.permute.xlu0 %1229 }
 0x1e3   :  { %v1275_v51 = vsub.f32 %v1230_v1, %v2409_v21  ;;  %v706_v1 = vld [vmem:[%s2567_s1 + $0x18] sm:$0xff] }
 0x1e4   :  { %v2415_v14 = vadd.f32 %v1186_v30, %v1089_v38  ;;  %v709_v30 = vld [vmem:[%s2567_s1 + $0x30] sm:$0xff] }
 0x1e5   :  { %v1133_v23 = vpop.permute.xlu2 %1132  ;;  %v1291_v33 = vmul.f32 %v1275_v51, %v1275_v51 }
 0x1e6   :  { %v1166_v15 = vsub.f32 %v1133_v23, %v2304_v55  ;;  %v1097_v61 = vpop.permute.xlu1 %1096 }
 0x1e7   :  { %v1157_v35 = vsub.f32 %v1097_v61, %v2304_v55 }
 0x1e8   :  { %v1182_v54 = vmul.f32 %v1166_v15, %v1166_v15 }
 0x1e9   :  { %v1173_v36 = vmul.f32 %v1157_v35, %v1157_v35 }
 0x1ea   :  { %v2421_v58 = vadd.f32 %v1182_v54, %v2290_v25  ;;  %v1242_v22 = vpop.permute.xlu0 %1241 }
 0x1eb   :  { %v1189_v18 = vadd.f32 %v1173_v36, %v2267_v0  ;;  %v1046_v0 = vsub.f32 %v2337_v44, %v2211_v27  ;;  %v1278_v28 = vsub.f32 %v1242_v22, %v2409_v21 }
 0x1ed   :  { %v1302_v3 = vadd.f32 %v1286_v47, %v1189_v18  ;;  %v1145_v11 = vpop.permute.xlu2 %1144  ;;  %v1062_v5 = vmul.f32 %v1046_v0, %v1046_v0  ;;  %v1294_v15 = vmul.f32 %v1278_v28, %v1278_v28 }
 0x1ee   :  { %v1169_v60 = vsub.f32 %v1145_v11, %v2304_v55  ;;  %v1105_v49 = vpop.permute.xlu1 %1104 }
 0x1ef   :  { %v1318_v46 = vsub.f32 1.0, %v1302_v3  ;;  %v1078_v44 = vadd.f32 %v1062_v5, %v2160_v41 }
 0x1f0   :  { %v1185_v24 = vmul.f32 %v1169_v60, %v1169_v60 }
 0x1f1   :  { %v1334_v16 = vmax.f32 %v1318_v46, 0.0 }
 0x1f2   :  { %v2429_v50 = vadd.f32 %v1185_v24, %v2307_v29  ;;  %v1159_v29 = vsub.f32 %v1105_v49, %v2304_v55  ;;  %v1254_v41 = vpop.permute.xlu0 %1253 }
 0x1f3   :  { %v1350_v25 = vmul.f32 %v1334_v16, %v704_v7  ;;  %v1281_v18 = vsub.f32 %v1254_v41, %v2409_v21  ;;  %v712_v7 = vld [vmem:[%s2567_s1 + $0x48] sm:$0xff] }
 0x1f4   :  { %v1175_v6 = vmul.f32 %v1159_v29, %v1159_v29 }
 0x1f5   :  { %1366 = vst [vmem:[%s2568_s7 + $0x8] sm:$0xff] %v1350_v25  ;;  %v1297_v0 = vmul.f32 %v1281_v18, %v1281_v18 }
 0x1f6   :  { %v1117_v31 = vpop.permute.xlu1 %1116  ;;  %v1206_v42 = vpop.permute.xlu2 %1205 }
 0x1f7   :  { %v1162_v10 = vsub.f32 %v1117_v31, %v2304_v55  ;;  %v1269_v13 = vsub.f32 %v1206_v42, %v2409_v21 }
 0x1f9   :  { %v1178_v43 = vmul.f32 %v1162_v10, %v1162_v10  ;;  %v1285_v40 = vmul.f32 %v1269_v13, %v1269_v13 }
 0x1fa   :  { %v1266_v31 = vpop.permute.xlu0 %1265 }
 0x1fb   :  { %v1194_v12 = vadd.f32 %v1178_v43, %v2301_v39  ;;  %v1301_v57 = vadd.f32 %v1285_v40, %v2331_v52  ;;  %v1191_v52 = vadd.f32 %v1175_v6, %v1078_v44  ;;  %v708_v43 = vld [vmem:[%s2567_s1 + $0x28] sm:$0xff]  ;;  %v715_v6 = vld [vmem:[%s2567_s1 + $0x60] sm:$0xff] }
 0x1fd   :  { %v1307_v4 = vadd.f32 %v1291_v33, %v1194_v12  ;;  %v1317_v27 = vsub.f32 1.0, %v1301_v57  ;;  %v1284_v33 = vsub.f32 %v1266_v31, %v2409_v21 }
 0x1fe   :  { %v1129_v62 = vpop.permute.xlu1 %1128  ;;  %v1218_v8 = vpop.permute.xlu2 %1217 }
 0x1ff   :  { %v1323_v59 = vsub.f32 1.0, %v1307_v4  ;;  %v1333_v56 = vmax.f32 %v1317_v27, 0.0  ;;  %v1165_v20 = vsub.f32 %v1129_v62, %v2304_v55  ;;  %v1272_v39 = vsub.f32 %v1218_v8, %v2409_v21 }
 0x201   :  { %v1339_v38 = vmax.f32 %v1323_v59, 0.0  ;;  %v1349_v34 = vmul.f32 %v1333_v56, %v703_v26  ;;  %v1181_v32 = vmul.f32 %v1165_v20, %v1165_v20  ;;  %v1288_v23 = vmul.f32 %v1272_v39, %v1272_v39  ;;  %v711_v20 = vld [vmem:[%s2567_s1 + $0x40] sm:$0xff] }
 0x202   :  { %v1300_v26 = vmul.f32 %v1284_v33, %v1284_v33 }
 0x203   :  { %v1355_v61 = vmul.f32 %v1339_v38, %v709_v30  ;;  %1365 = vst [vmem:[%s2568_s7] sm:$0xff] %v1349_v34  ;;  %v1197_v35 = vadd.f32 %v1181_v32, %v2321_v63  ;;  %v1304_v54 = vadd.f32 %v1288_v23, %v1191_v52 }
 0x205   :  { %1371 = vst [vmem:[%s2568_s7 + $0x30] sm:$0xff] %v1355_v61  ;;  %v1310_v47 = vadd.f32 %v1294_v15, %v1197_v35  ;;  %v1320_v36 = vsub.f32 1.0, %v1304_v54 }
 0x206   :  { %v1141_v3 = vpop.permute.xlu1 %1140  ;;  %v1226_v11 = vpop.permute.xlu2 %1225 }
 0x207   :  { %v1326_v60 = vsub.f32 1.0, %v1310_v47  ;;  %v1336_v49 = vmax.f32 %v1320_v36, 0.0  ;;  %v1168_v46 = vsub.f32 %v1141_v3, %v2304_v55  ;;  %v1274_v63 = vsub.f32 %v1226_v11, %v2409_v21  ;;  %v714_v36 = vld [vmem:[%s2567_s1 + $0x58] sm:$0xff]  ;;  %v705_v11 = vld [vmem:[%s2567_s1 + $0x10] sm:$0xff] }
 0x209   :  { %v1342_v24 = vmax.f32 %v1326_v60, 0.0  ;;  %v1352_v16 = vmul.f32 %v1336_v49, %v706_v1  ;;  %v1184_v25 = vmul.f32 %v1168_v46, %v1168_v46  ;;  %v1290_v51 = vmul.f32 %v1274_v63, %v1274_v63 }
 0x20b   :  { %v1358_v42 = vmul.f32 %v1342_v24, %v712_v7  ;;  %1368 = vst [vmem:[%s2568_s7 + $0x18] sm:$0xff] %v1352_v16  ;;  %v1200_v22 = vadd.f32 %v1184_v25, %v2344_v17  ;;  %v1306_v10 = vadd.f32 %v1290_v51, %v2372_v37 }
 0x20d   :  { %1374 = vst [vmem:[%s2568_s7 + $0x48] sm:$0xff] %v1358_v42  ;;  %v1313_v13 = vadd.f32 %v1297_v0, %v1200_v22  ;;  %v1322_v29 = vsub.f32 1.0, %v1306_v10  ;;  %v717_v0 = vld [vmem:[%s2567_s1 + $0x70] sm:$0xff]  ;;  %v707_v22 = vld [vmem:[%s2567_s1 + $0x20] sm:$0xff] }
 0x20e   :  { %v1153_v40 = vpop.permute.xlu1 %1152  ;;  %v1238_v5 = vpop.permute.xlu2 %1237 }
 0x20f   :  { %v1329_v12 = vsub.f32 1.0, %v1313_v13  ;;  %v1338_v57 = vmax.f32 %v1322_v29, 0.0  ;;  %v1171_v17 = vsub.f32 %v1153_v40, %v2304_v55  ;;  %v1277_v37 = vsub.f32 %v1238_v5, %v2409_v21  ;;  %v710_v5 = vld [vmem:[%s2567_s1 + $0x38] sm:$0xff] }
 0x211   :  { %v1345_v4 = vmax.f32 %v1329_v12, 0.0  ;;  %v1354_v27 = vmul.f32 %v1338_v57, %v708_v43  ;;  %v1187_v44 = vmul.f32 %v1171_v17, %v1171_v17  ;;  %v1293_v28 = vmul.f32 %v1277_v37, %v1277_v37 }
 0x213   :  { %v1361_v62 = vmul.f32 %v1345_v4, %v715_v6  ;;  %1370 = vst [vmem:[%s2568_s7 + $0x28] sm:$0xff] %v1354_v27  ;;  %v1203_v8 = vadd.f32 %v1187_v44, %v2365_v19  ;;  %v1309_v55 = vadd.f32 %v1293_v28, %v2389_v45  ;;  %v718_v19 = vld [vmem:[%s2567_s1 + $0x78] sm:$0xff] }
 0x215   :  { %1377 = vst [vmem:[%s2568_s7 + $0x60] sm:$0xff] %v1361_v62  ;;  %v1316_v59 = vadd.f32 %v1300_v26, %v1203_v8  ;;  %v1325_v56 = vsub.f32 1.0, %v1309_v55 }
 0x216   :  { %v1250_v39 = vpop.permute.xlu2 %1249 }
 0x217   :  { %v1332_v52 = vsub.f32 1.0, %v1316_v59  ;;  %v1341_v30 = vmax.f32 %v1325_v56, 0.0  ;;  %v1280_v41 = vsub.f32 %v1250_v39, %v2409_v21  ;;  %v1214_v38 = vpop.permute.xlu1 %1213 }
 0x218   :  { %v1271_v45 = vsub.f32 %v1214_v38, %v2409_v21 }
 0x219   :  { %v1348_v34 = vmax.f32 %v1332_v52, 0.0  ;;  %v1357_v32 = vmul.f32 %v1341_v30, %v711_v20  ;;  %v1296_v23 = vmul.f32 %v1280_v41, %v1280_v41 }
 0x21a   :  { %v1287_v15 = vmul.f32 %v1271_v45, %v1271_v45 }
 0x21b   :  { %v1364_v61 = vmul.f32 %v1348_v34, %v718_v19  ;;  %1373 = vst [vmem:[%s2568_s7 + $0x40] sm:$0xff] %v1357_v32  ;;  %v1312_v35 = vadd.f32 %v1296_v23, %v2402_v53 }
 0x21c   :  { %v1303_v54 = vadd.f32 %v1287_v15, %v2387_v2 }
 0x21d   :  { %1380 = vst [vmem:[%s2568_s7 + $0x78] sm:$0xff] %v1364_v61  ;;  %v1328_v47 = vsub.f32 1.0, %v1312_v35 }
 0x21e   :  { %v1319_v18 = vsub.f32 1.0, %v1303_v54  ;;  %v1262_v1 = vpop.permute.xlu2 %1261 }
 0x21f   :  { %v1344_v3 = vmax.f32 %v1328_v47, 0.0  ;;  %v1283_v53 = vsub.f32 %v1262_v1, %v2409_v21  ;;  %v1222_v60 = vpop.permute.xlu1 %1221 }
 0x220   :  { %v1335_v2 = vmax.f32 %v1319_v18, 0.0  ;;  %v1273_v49 = vsub.f32 %v1222_v60, %v2409_v21 }
 0x221   :  { %v1360_v46 = vmul.f32 %v1344_v3, %v714_v36  ;;  %v1299_v63 = vmul.f32 %v1283_v53, %v1283_v53 }
 0x222   :  { %v1351_v7 = vmul.f32 %v1335_v2, %v705_v11  ;;  %v1289_v24 = vmul.f32 %v1273_v49, %v1273_v49 }
 0x223   :  { %1376 = vst [vmem:[%s2568_s7 + $0x58] sm:$0xff] %v1360_v46  ;;  %v1315_v16 = vadd.f32 %v1299_v63, %v2415_v14 }
 0x224   :  { %1367 = vst [vmem:[%s2568_s7 + $0x10] sm:$0xff] %v1351_v7  ;;  %v1305_v25 = vadd.f32 %v1289_v24, %v2400_v48 }
 0x225   :  { %v1331_v51 = vsub.f32 1.0, %v1315_v16 }
 0x226   :  { %v1321_v31 = vsub.f32 1.0, %v1305_v25 }
 0x227   :  { %v1347_v42 = vmax.f32 %v1331_v51, 0.0  ;;  %v1234_v10 = vpop.permute.xlu1 %1233 }
 0x228   :  { %v1337_v13 = vmax.f32 %v1321_v31, 0.0  ;;  %v1276_v14 = vsub.f32 %v1234_v10, %v2409_v21 }
 0x229   :  { %v1363_v29 = vmul.f32 %v1347_v42, %v717_v0 }
 0x22a   :  { %v1353_v33 = vmul.f32 %v1337_v13, %v707_v22  ;;  %v1292_v43 = vmul.f32 %v1276_v14, %v1276_v14 }
 0x22b   :  { %1379 = vst [vmem:[%s2568_s7 + $0x70] sm:$0xff] %v1363_v29 }
 0x22c   :  { %1369 = vst [vmem:[%s2568_s7 + $0x20] sm:$0xff] %v1353_v33  ;;  %v1308_v48 = vadd.f32 %v1292_v43, %v2413_v9  ;;  %v713_v9 = vld [vmem:[%s2567_s1 + $0x50] sm:$0xff] }
 0x22e   :  { %v1324_v40 = vsub.f32 1.0, %v1308_v48 }
 0x22f   :  { %v1246_v12 = vpop.permute.xlu1 %1245 }
 0x230   :  { %v1340_v57 = vmax.f32 %v1324_v40, 0.0  ;;  %v1279_v17 = vsub.f32 %v1246_v12, %v2409_v21 }
 0x232   :  { %v1356_v37 = vmul.f32 %v1340_v57, %v710_v5  ;;  %v1295_v6 = vmul.f32 %v1279_v17, %v1279_v17 }
 0x234   :  { %1372 = vst [vmem:[%s2568_s7 + $0x38] sm:$0xff] %v1356_v37  ;;  %v1311_v4 = vadd.f32 %v1295_v6, %v2421_v58  ;;  %v716_v58 = vld [vmem:[%s2567_s1 + $0x68] sm:$0xff] }
 0x236   :  { %v1327_v27 = vsub.f32 1.0, %v1311_v4 }
 0x237   :  { %v1258_v44 = vpop.permute.xlu1 %1257 }
 0x238   :  { %v1343_v28 = vmax.f32 %v1327_v27, 0.0  ;;  %v1282_v26 = vsub.f32 %v1258_v44, %v2409_v21 }
 0x23a   :  { %v1359_v62 = vmul.f32 %v1343_v28, %v713_v9  ;;  %v1298_v8 = vmul.f32 %v1282_v26, %v1282_v26 }
 0x23c   :  { %1375 = vst [vmem:[%s2568_s7 + $0x50] sm:$0xff] %v1359_v62  ;;  %v1314_v55 = vadd.f32 %v1298_v8, %v2429_v50 }
 0x23e   :  { %v1330_v59 = vsub.f32 1.0, %v1314_v55 }
 0x240   :  { %v1346_v56 = vmax.f32 %v1330_v59, 0.0 }
 0x242   :  { %v1362_v20 = vmul.f32 %v1346_v56, %v716_v58 }
 0x244   :  { %1378 = vst [vmem:[%s2568_s7 + $0x68] sm:$0xff] %v1362_v20 }

</bundles_post_ra>
